<compile_context>
chip_gen: v7x
topology: tpu7x:2x2x1
jax: 0.10.0
libtpu: 0.0.40
codegen_flags: <defaults>
</compile_context>

<pallas_src>
import math
import jax
import jax.numpy as jnp
from jax import lax
from jax.experimental import pallas as pl
from jax.experimental.pallas import tpu as pltpu

# ----------------------------- config -------------------------------------
B_TOTAL = 16      # total batch rows processed per call
ROWS = 8          # batch rows per grid step (f32 sublane multiple)
GRID_M = B_TOTAL // ROWS
N_PATCH = 16      # number of vision tokens
VISION_DIM = 1024
TEXT_DIM = 768    # CLIP ViT-L/14 text hidden size
HIDDEN = 128      # hidden_size
OUT_LANES = 128   # lane-dense packed output width
PARAM_ROWS = 16   # packed small-param rows (10 used, padded to 16)
LN_EPS = 1e-5
NORM_EPS = 1e-12  # F.normalize eps


def _gelu_exact(x):
    # exact erf-GELU to match PyTorch nn.GELU default
    return 0.5 * x * (1.0 + lax.erf(x * jnp.float32(0.7071067811865476)))


def _layernorm(x, gamma, beta):
    mu = jnp.mean(x, axis=-1, keepdims=True)
    var = jnp.mean((x - mu) ** 2, axis=-1, keepdims=True)
    return (x - mu) * lax.rsqrt(var + LN_EPS) * gamma + beta


def _l2_normalize(x):
    # F.normalize: x / max(||x||, eps)  ==  x * rsqrt(max(sumsq, eps^2))
    sumsq = jnp.sum(x * x, axis=-1, keepdims=True)
    return x * lax.rsqrt(jnp.maximum(sumsq, NORM_EPS * NORM_EPS))


# ----------------------------- kernel --------------------------------------
def concat_head_kernel(
    img_ref,      # (ROWS*N_PATCH, VISION_DIM) f32   -- per-step activation tile
    txt_ref,      # (ROWS, TEXT_DIM)           f32   -- per-step activation tile
    labels_ref,   # (ROWS, 1)                  f32   -- per-step labels
    wv_ref,       # (VISION_DIM, HIDDEN)       bf16  -- resident weight
    wt_ref,       # (TEXT_DIM, HIDDEN)         bf16  -- resident weight
    w1t_ref,      # (HIDDEN, HIDDEN)           bf16  -- text half of concat weight
    w1v_ref,      # (HIDDEN, HIDDEN)           bf16  -- vision half of concat weight
    w2_ref,       # (HIDDEN, HIDDEN)           bf16  -- resident weight
    p_ref,        # (PARAM_ROWS, HIDDEN)       f32   -- packed small params
    out_ref,      # (ROWS, OUT_LANES)          f32   -- packed per-row outputs
):
    # packed param rows: 0=bv 1=bt 2=b1 3=g1 4=be1 5=b2 6=g2 7=be2 8=w3row 9=b3
    p = p_ref[...]                                   # (16,128) f32, 2 vregs
    bv, bt = p[0:1, :], p[1:2, :]
    b1, g1, be1 = p[2:3, :], p[3:4, :], p[4:5, :]
    b2, g2, be2 = p[5:6, :], p[6:7, :], p[7:8, :]
    w3_row = p[8:9, :]
    b3 = p[9:10, 0:1]                                # (1,1) scalar bias

    # ---- vision branch: project-then-pool (mean commutes with the linear) ----
    imgs = img_ref[...].astype(jnp.bfloat16)         # (ROWS*N_PATCH, 1024) bf16
    pv = jnp.dot(imgs, wv_ref[...],
                 preferred_element_type=jnp.float32)  # (ROWS*N_PATCH, H) f32
    v = jnp.mean(pv.reshape(ROWS, N_PATCH, HIDDEN), axis=1) + bv   # (ROWS, H)
    v = _l2_normalize(v)

    # ---- text branch: project, normalize ----
    t = jnp.dot(txt_ref[...].astype(jnp.bfloat16), wt_ref[...],
                preferred_element_type=jnp.float32) + bt            # (ROWS, H)
    t = _l2_normalize(t)

    # ---- cat_mlp layer 1: concat([t, v]) @ w1 folded into two matmuls ----
    h = (jnp.dot(t.astype(jnp.bfloat16), w1t_ref[...],
                 preferred_element_type=jnp.float32)
         + jnp.dot(v.astype(jnp.bfloat16), w1v_ref[...],
                   preferred_element_type=jnp.float32)
         + b1)
    h = _gelu_exact(_layernorm(h, g1, be1))
    # TODO(synk): nn.Dropout(0.3) skipped (eval-mode identity).

    # ---- cat_mlp layer 2 ----
    h = jnp.dot(h.astype(jnp.bfloat16), w2_ref[...],
                preferred_element_type=jnp.float32) + b2
    h = _gelu_exact(_layernorm(h, g2, be2))

    # ---- final Linear(H, 1) as VPU multiply + lane reduction ----
    logits = jnp.sum(h * w3_row, axis=-1, keepdims=True) + b3       # (ROWS, 1)

    # ---- per-sample loss / predictions / correctness ----
    y = labels_ref[...]                                             # (ROWS, 1)
    bce = (jnp.maximum(logits, 0.0) - logits * y
           + jnp.log1p(jnp.exp(-jnp.abs(logits))))                  # (ROWS, 1)
    preds = jax.nn.sigmoid(logits)                                  # (ROWS, 1)
    correct = ((preds >= 0.5).astype(jnp.float32) == y).astype(jnp.float32)

    # ---- pack into one lane-dense (ROWS, 128) f32 block ----
    col = lax.broadcasted_iota(jnp.int32, (ROWS, OUT_LANES), 1)
    packed = jnp.where(col == 0, preds, 0.0)      # lane 0: predictions
    packed = jnp.where(col == 1, bce, packed)     # lane 1: per-sample BCE
    packed = jnp.where(col == 2, correct, packed) # lane 2: per-sample correct
    out_ref[...] = packed


# ----------------------------- param prep (once, not per call) --------------
def prepare_params(params):
    (wv, bv, wt, bt, w1, b1, g1, be1, w2, b2, g2, be2, w3, b3) = params
    bf16 = jnp.bfloat16
    p_rows = jnp.concatenate(
        [
            bv.reshape(1, HIDDEN), bt.reshape(1, HIDDEN),
            b1.reshape(1, HIDDEN), g1.reshape(1, HIDDEN), be1.reshape(1, HIDDEN),
            b2.reshape(1, HIDDEN), g2.reshape(1, HIDDEN), be2.reshape(1, HIDDEN),
            w3.reshape(1, HIDDEN),                     # (H,1) column -> (1,H) row
            jnp.broadcast_to(b3.reshape(1, 1), (1, HIDDEN)),
            jnp.zeros((PARAM_ROWS - 10, HIDDEN), jnp.float32),
        ],
        axis=0,
    )  # (16, 128) f32
    return {
        "wv": wv.astype(bf16),
        "wt": wt.astype(bf16),
        "w1t": w1[:HIDDEN].astype(bf16),   # text half of the concat weight
        "w1v": w1[HIDDEN:].astype(bf16),   # vision half of the concat weight
        "w2": w2.astype(bf16),
        "p": p_rows,
    }


# ----------------------------- wrapper --------------------------------------
def concat_model_head(img_feats, txt_emb, labels, prep):
    # img_feats: (B_TOTAL, N_PATCH, VISION_DIM) f32  (encoder output stand-in)
    # TODO(synk): in a real pipeline, fuse the encoder epilogue so bf16
    # activations are materialized upstream; here we DMA f32 and cast in-kernel.
    bt_total = img_feats.shape[0]
    assert bt_total % ROWS == 0
    grid_m = bt_total // ROWS
    img2d = img_feats.reshape(bt_total * N_PATCH, VISION_DIM)  # free reshape

    grid_spec = pltpu.PrefetchScalarGridSpec(
        num_scalar_prefetch=0,
        grid=(grid_m,),
        in_specs=[
            # per-step activation tiles
            pl.BlockSpec((ROWS * N_PATCH, VISION_DIM), lambda i: (i, 0)),
            pl.BlockSpec((ROWS, TEXT_DIM), lambda i: (i, 0)),
            pl.BlockSpec((ROWS, 1), lambda i: (i, 0)),
            # weights: constant index_map -> DMA'd once, VMEM-resident
            pl.BlockSpec((VISION_DIM, HIDDEN), lambda i: (0, 0)),
            pl.BlockSpec((TEXT_DIM, HIDDEN), lambda i: (0, 0)),
            pl.BlockSpec((HIDDEN, HIDDEN), lambda i: (0, 0)),
            pl.BlockSpec((HIDDEN, HIDDEN), lambda i: (0, 0)),
            pl.BlockSpec((HIDDEN, HIDDEN), lambda i: (0, 0)),
            pl.BlockSpec((PARAM_ROWS, HIDDEN), lambda i: (0, 0)),
        ],
        out_specs=pl.BlockSpec((ROWS, OUT_LANES), lambda i: (i, 0)),
    )

    packed = pl.pallas_call(
        concat_head_kernel,
        out_shape=jax.ShapeDtypeStruct((bt_total, OUT_LANES), jnp.float32),
        grid_spec=grid_spec,
        compiler_params=pltpu.CompilerParams(
            dimension_semantics=("parallel",),
            vmem_limit_bytes=16 << 20,
        ),
    )(img2d, txt_emb, labels,
      prep["wv"], prep["wt"], prep["w1t"], prep["w1v"], prep["w2"], prep["p"])

    preds = packed[:, 0:1]             # (B_TOTAL, 1) sigmoid probabilities
    loss = jnp.mean(packed[:, 1])      # mean BCE-with-logits over the batch
    acc = jnp.mean(packed[:, 2])       # binary accuracy
    return preds, loss, acc


# ----------------------------- param init -----------------------------------
def init_params(key):
    ks = jax.random.split(key, 5)

    def kaiming(k, fan_in, shape):
        # kaiming_normal_ with nonlinearity='relu': std = sqrt(2 / fan_in)
        return (jax.random.normal(k, shape, jnp.float32)
                * math.sqrt(2.0 / fan_in))

    # vision_projection: Linear(1024, H); stored as (in, out)
    wv = kaiming(ks[0], VISION_DIM, (VISION_DIM, HIDDEN))
    bv = jnp.zeros((1, HIDDEN), jnp.float32)
    # text_projection: Linear(768, H)
    wt = kaiming(ks[1], TEXT_DIM, (TEXT_DIM, HIDDEN))
    bt = jnp.zeros((1, HIDDEN), jnp.float32)
    # cat_mlp layer 1: Linear(2H, H) + LayerNorm(H)
    w1 = kaiming(ks[2], 2 * HIDDEN, (2 * HIDDEN, HIDDEN))
    b1 = jnp.zeros((1, HIDDEN), jnp.float32)
    g1 = jnp.ones((1, HIDDEN), jnp.float32)
    be1 = jnp.zeros((1, HIDDEN), jnp.float32)
    # cat_mlp layer 2: Linear(H, H) + LayerNorm(H)
    w2 = kaiming(ks[3], HIDDEN, (HIDDEN, HIDDEN))
    b2 = jnp.zeros((1, HIDDEN), jnp.float32)
    g2 = jnp.ones((1, HIDDEN), jnp.float32)
    be2 = jnp.zeros((1, HIDDEN), jnp.float32)
    # final Linear(H, 1): normal(0, 0.01), bias = 0.1
    w3 = jax.random.normal(ks[4], (HIDDEN, 1), jnp.float32) * 0.01
    b3 = jnp.full((1, 1), 0.1, jnp.float32)

    return (wv, bv, wt, bt, w1, b1, g1, be1, w2, b2, g2, be2, w3, b3)


# ----------------------------- main ------------------------------------------
if __name__ == "__main__":
    key = jax.random.PRNGKey(0)
    k_img, k_txt, k_lbl, k_par = jax.random.split(key, 4)

    # stand-ins for the (untranslated) CLIP vision / text encoder outputs
    img_feats = jax.random.normal(
        k_img, (B_TOTAL, N_PATCH, VISION_DIM), jnp.float32)
    txt_emb = jax.random.normal(k_txt, (B_TOTAL, TEXT_DIM), jnp.float32)
    # answers: 'yes'/'no' -> {1.0, 0.0}
    labels = jax.random.bernoulli(k_lbl, 0.5, (B_TOTAL, 1)).astype(jnp.float32)

    params = init_params(k_par)
    prep = prepare_params(params)          # one-time weight split / bf16 cast / pack
    jax.block_until_ready(prep)

    preds, loss, acc = concat_model_head(img_feats, txt_emb, labels, prep)
    jax.block_until_ready((preds, loss, acc))

    assert preds.shape == (B_TOTAL, 1)
    assert bool(jnp.all((preds >= 0.0) & (preds <= 1.0)))
    assert bool(jnp.isfinite(loss))
    assert 0.0 <= float(acc) <= 1.0
    print("KERNEL_OK")
</pallas_src>

<mosaic_0001>
module attributes {stable_mosaic.version = 11 : i64} {
  func.func @concat_head_kernel(%arg0: i32, %arg1: memref<128x1024xf32, #tpu.memory_space<vmem>>, %arg2: memref<8x768xf32, #tpu.memory_space<vmem>>, %arg3: memref<8x1xf32, #tpu.memory_space<vmem>>, %arg4: memref<1024x128xbf16, #tpu.memory_space<vmem>>, %arg5: memref<768x128xbf16, #tpu.memory_space<vmem>>, %arg6: memref<128x128xbf16, #tpu.memory_space<vmem>>, %arg7: memref<128x128xbf16, #tpu.memory_space<vmem>>, %arg8: memref<128x128xbf16, #tpu.memory_space<vmem>>, %arg9: memref<16x128xf32, #tpu.memory_space<vmem>>, %arg10: memref<8x128xf32, #tpu.memory_space<vmem>>) attributes {dimension_semantics = [#tpu.dimension_semantics<parallel>], iteration_bounds = array<i64: 2>, scalar_prefetch = 0 : i64, scratch_operands = 0 : i64, tpu.core_type = #tpu.core_type<tc>, window_params = [{transform_indices = @transform_0, window_bounds = array<i64: 128, 1024>}, {transform_indices = @transform_1, window_bounds = array<i64: 8, 768>}, {transform_indices = @transform_2, window_bounds = array<i64: 8, 1>}, {pipeline_mode = #tpu.pipeline_mode<synchronous>, transform_indices = @transform_3, window_bounds = array<i64: 1024, 128>}, {pipeline_mode = #tpu.pipeline_mode<synchronous>, transform_indices = @transform_4, window_bounds = array<i64: 768, 128>}, {pipeline_mode = #tpu.pipeline_mode<synchronous>, transform_indices = @transform_5, window_bounds = array<i64: 128, 128>}, {pipeline_mode = #tpu.pipeline_mode<synchronous>, transform_indices = @transform_6, window_bounds = array<i64: 128, 128>}, {pipeline_mode = #tpu.pipeline_mode<synchronous>, transform_indices = @transform_7, window_bounds = array<i64: 128, 128>}, {pipeline_mode = #tpu.pipeline_mode<synchronous>, transform_indices = @transform_8, window_bounds = array<i64: 16, 128>}, {transform_indices = @transform_9, window_bounds = array<i64: 8, 128>}]} {
    %c0 = arith.constant 0 : index
    %c0_0 = arith.constant 0 : index
    %0 = vector.load %arg9[%c0, %c0_0] : memref<16x128xf32, #tpu.memory_space<vmem>>, vector<16x128xf32>
    %1 = vector.extract_strided_slice %0 {offsets = [0, 0], sizes = [1, 128], strides = [1, 1]} : vector<16x128xf32> to vector<1x128xf32>
    %2 = vector.extract_strided_slice %0 {offsets = [1, 0], sizes = [1, 128], strides = [1, 1]} : vector<16x128xf32> to vector<1x128xf32>
    %3 = vector.extract_strided_slice %0 {offsets = [2, 0], sizes = [1, 128], strides = [1, 1]} : vector<16x128xf32> to vector<1x128xf32>
    %4 = vector.extract_strided_slice %0 {offsets = [3, 0], sizes = [1, 128], strides = [1, 1]} : vector<16x128xf32> to vector<1x128xf32>
    %5 = vector.extract_strided_slice %0 {offsets = [4, 0], sizes = [1, 128], strides = [1, 1]} : vector<16x128xf32> to vector<1x128xf32>
    %6 = vector.extract_strided_slice %0 {offsets = [5, 0], sizes = [1, 128], strides = [1, 1]} : vector<16x128xf32> to vector<1x128xf32>
    %7 = vector.extract_strided_slice %0 {offsets = [6, 0], sizes = [1, 128], strides = [1, 1]} : vector<16x128xf32> to vector<1x128xf32>
    %8 = vector.extract_strided_slice %0 {offsets = [7, 0], sizes = [1, 128], strides = [1, 1]} : vector<16x128xf32> to vector<1x128xf32>
    %9 = vector.extract_strided_slice %0 {offsets = [8, 0], sizes = [1, 128], strides = [1, 1]} : vector<16x128xf32> to vector<1x128xf32>
    %10 = vector.extract_strided_slice %0 {offsets = [9, 0], sizes = [1, 1], strides = [1, 1]} : vector<16x128xf32> to vector<1x1xf32>
    %c0_1 = arith.constant 0 : index
    %c0_2 = arith.constant 0 : index
    %11 = vector.load %arg1[%c0_1, %c0_2] : memref<128x1024xf32, #tpu.memory_space<vmem>>, vector<128x1024xf32>
    %12 = arith.truncf %11 : vector<128x1024xf32> to vector<128x1024xbf16>
    %c0_3 = arith.constant 0 : index
    %c0_4 = arith.constant 0 : index
    %13 = vector.load %arg4[%c0_3, %c0_4] : memref<1024x128xbf16, #tpu.memory_space<vmem>>, vector<1024x128xbf16>
    %cst = arith.constant dense<0.000000e+00> : vector<128x128xf32>
    %14 = tpu.matmul %12, %13, %cst {dimension_numbers = #tpu.dot_dimension_numbers<[1], [0], [0], [1], [0, 0, 1, 1], [], []>} : vector<128x1024xbf16>, vector<1024x128xbf16>, vector<128x128xf32> -> vector<128x128xf32>
    %15 = vector.shape_cast %14 : vector<128x128xf32> to vector<8x16x128xf32>
    %cst_5 = arith.constant dense<0.000000e+00> : vector<8x128xf32>
    %16 = vector.multi_reduction <add>, %15, %cst_5 [1] : vector<8x16x128xf32> to vector<8x128xf32>
    %cst_6 = arith.constant 1.600000e+01 : f32
    %17 = vector.broadcast %cst_6 : f32 to vector<8x128xf32>
    %18 = arith.divf %16, %17 : vector<8x128xf32>
    %19 = vector.broadcast %1 : vector<1x128xf32> to vector<8x128xf32>
    %20 = arith.addf %18, %19 : vector<8x128xf32>
    %21 = arith.mulf %20, %20 : vector<8x128xf32>
    %cst_7 = arith.constant dense<0.000000e+00> : vector<8xf32>
    %22 = vector.multi_reduction <add>, %21, %cst_7 [1] : vector<8x128xf32> to vector<8xf32>
    %23 = vector.shape_cast %22 : vector<8xf32> to vector<8x1xf32>
    %cst_8 = arith.constant 1.000000e-24 : f32
    %24 = vector.broadcast %cst_8 : f32 to vector<8x1xf32>
    %25 = arith.maximumf %23, %24 : vector<8x1xf32>
    %26 = math.rsqrt %25 : vector<8x1xf32>
    %27 = vector.broadcast %26 : vector<8x1xf32> to vector<8x128xf32>
    %28 = arith.mulf %20, %27 : vector<8x128xf32>
    %c0_9 = arith.constant 0 : index
    %c0_10 = arith.constant 0 : index
    %29 = vector.load %arg2[%c0_9, %c0_10] : memref<8x768xf32, #tpu.memory_space<vmem>>, vector<8x768xf32>
    %30 = arith.truncf %29 : vector<8x768xf32> to vector<8x768xbf16>
    %c0_11 = arith.constant 0 : index
    %c0_12 = arith.constant 0 : index
    %31 = vector.load %arg5[%c0_11, %c0_12] : memref<768x128xbf16, #tpu.memory_space<vmem>>, vector<768x128xbf16>
    %cst_13 = arith.constant dense<0.000000e+00> : vector<8x128xf32>
    %32 = tpu.matmul %30, %31, %cst_13 {dimension_numbers = #tpu.dot_dimension_numbers<[1], [0], [0], [1], [0, 0, 1, 1], [], []>} : vector<8x768xbf16>, vector<768x128xbf16>, vector<8x128xf32> -> vector<8x128xf32>
    %33 = vector.broadcast %2 : vector<1x128xf32> to vector<8x128xf32>
    %34 = arith.addf %32, %33 : vector<8x128xf32>
    %35 = arith.mulf %34, %34 : vector<8x128xf32>
    %cst_14 = arith.constant dense<0.000000e+00> : vector<8xf32>
    %36 = vector.multi_reduction <add>, %35, %cst_14 [1] : vector<8x128xf32> to vector<8xf32>
    %37 = vector.shape_cast %36 : vector<8xf32> to vector<8x1xf32>
    %cst_15 = arith.constant 1.000000e-24 : f32
    %38 = vector.broadcast %cst_15 : f32 to vector<8x1xf32>
    %39 = arith.maximumf %37, %38 : vector<8x1xf32>
    %40 = math.rsqrt %39 : vector<8x1xf32>
    %41 = vector.broadcast %40 : vector<8x1xf32> to vector<8x128xf32>
    %42 = arith.mulf %34, %41 : vector<8x128xf32>
    %43 = arith.truncf %42 : vector<8x128xf32> to vector<8x128xbf16>
    %c0_16 = arith.constant 0 : index
    %c0_17 = arith.constant 0 : index
    %44 = vector.load %arg6[%c0_16, %c0_17] : memref<128x128xbf16, #tpu.memory_space<vmem>>, vector<128x128xbf16>
    %cst_18 = arith.constant dense<0.000000e+00> : vector<8x128xf32>
    %45 = tpu.matmul %43, %44, %cst_18 {dimension_numbers = #tpu.dot_dimension_numbers<[1], [0], [0], [1], [0, 0, 1, 1], [], []>} : vector<8x128xbf16>, vector<128x128xbf16>, vector<8x128xf32> -> vector<8x128xf32>
    %46 = arith.truncf %28 : vector<8x128xf32> to vector<8x128xbf16>
    %c0_19 = arith.constant 0 : index
    %c0_20 = arith.constant 0 : index
    %47 = vector.load %arg7[%c0_19, %c0_20] : memref<128x128xbf16, #tpu.memory_space<vmem>>, vector<128x128xbf16>
    %cst_21 = arith.constant dense<0.000000e+00> : vector<8x128xf32>
    %48 = tpu.matmul %46, %47, %cst_21 {dimension_numbers = #tpu.dot_dimension_numbers<[1], [0], [0], [1], [0, 0, 1, 1], [], []>} : vector<8x128xbf16>, vector<128x128xbf16>, vector<8x128xf32> -> vector<8x128xf32>
    %49 = arith.addf %45, %48 : vector<8x128xf32>
    %50 = vector.broadcast %3 : vector<1x128xf32> to vector<8x128xf32>
    %51 = arith.addf %49, %50 : vector<8x128xf32>
    %cst_22 = arith.constant dense<0.000000e+00> : vector<8xf32>
    %52 = vector.multi_reduction <add>, %51, %cst_22 [1] : vector<8x128xf32> to vector<8xf32>
    %53 = vector.shape_cast %52 : vector<8xf32> to vector<8x1xf32>
    %cst_23 = arith.constant 1.280000e+02 : f32
    %54 = vector.broadcast %cst_23 : f32 to vector<8x1xf32>
    %55 = arith.divf %53, %54 : vector<8x1xf32>
    %56 = vector.broadcast %55 : vector<8x1xf32> to vector<8x128xf32>
    %57 = arith.subf %51, %56 : vector<8x128xf32>
    %58 = arith.mulf %57, %57 : vector<8x128xf32>
    %cst_24 = arith.constant dense<0.000000e+00> : vector<8xf32>
    %59 = vector.multi_reduction <add>, %58, %cst_24 [1] : vector<8x128xf32> to vector<8xf32>
    %60 = vector.shape_cast %59 : vector<8xf32> to vector<8x1xf32>
    %cst_25 = arith.constant 1.280000e+02 : f32
    %61 = vector.broadcast %cst_25 : f32 to vector<8x1xf32>
    %62 = arith.divf %60, %61 : vector<8x1xf32>
    %63 = vector.broadcast %55 : vector<8x1xf32> to vector<8x128xf32>
    %64 = arith.subf %51, %63 : vector<8x128xf32>
    %cst_26 = arith.constant 9.99999974E-6 : f32
    %65 = vector.broadcast %cst_26 : f32 to vector<8x1xf32>
    %66 = arith.addf %62, %65 : vector<8x1xf32>
    %67 = math.rsqrt %66 : vector<8x1xf32>
    %68 = vector.broadcast %67 : vector<8x1xf32> to vector<8x128xf32>
    %69 = arith.mulf %64, %68 : vector<8x128xf32>
    %70 = vector.broadcast %4 : vector<1x128xf32> to vector<8x128xf32>
    %71 = arith.mulf %69, %70 : vector<8x128xf32>
    %72 = vector.broadcast %5 : vector<1x128xf32> to vector<8x128xf32>
    %73 = arith.addf %71, %72 : vector<8x128xf32>
    %cst_27 = arith.constant 5.000000e-01 : f32
    %74 = vector.broadcast %cst_27 : f32 to vector<8x128xf32>
    %75 = arith.mulf %74, %73 : vector<8x128xf32>
    %cst_28 = arith.constant 0.707106769 : f32
    %76 = vector.broadcast %cst_28 : f32 to vector<8x128xf32>
    %77 = arith.mulf %73, %76 : vector<8x128xf32>
    %78 = math.erf %77 : vector<8x128xf32>
    %cst_29 = arith.constant 1.000000e+00 : f32
    %79 = vector.broadcast %cst_29 : f32 to vector<8x128xf32>
    %80 = arith.addf %79, %78 : vector<8x128xf32>
    %81 = arith.mulf %75, %80 : vector<8x128xf32>
    %82 = arith.truncf %81 : vector<8x128xf32> to vector<8x128xbf16>
    %c0_30 = arith.constant 0 : index
    %c0_31 = arith.constant 0 : index
    %83 = vector.load %arg8[%c0_30, %c0_31] : memref<128x128xbf16, #tpu.memory_space<vmem>>, vector<128x128xbf16>
    %cst_32 = arith.constant dense<0.000000e+00> : vector<8x128xf32>
    %84 = tpu.matmul %82, %83, %cst_32 {dimension_numbers = #tpu.dot_dimension_numbers<[1], [0], [0], [1], [0, 0, 1, 1], [], []>} : vector<8x128xbf16>, vector<128x128xbf16>, vector<8x128xf32> -> vector<8x128xf32>
    %85 = vector.broadcast %6 : vector<1x128xf32> to vector<8x128xf32>
    %86 = arith.addf %84, %85 : vector<8x128xf32>
    %cst_33 = arith.constant dense<0.000000e+00> : vector<8xf32>
    %87 = vector.multi_reduction <add>, %86, %cst_33 [1] : vector<8x128xf32> to vector<8xf32>
    %88 = vector.shape_cast %87 : vector<8xf32> to vector<8x1xf32>
    %cst_34 = arith.constant 1.280000e+02 : f32
    %89 = vector.broadcast %cst_34 : f32 to vector<8x1xf32>
    %90 = arith.divf %88, %89 : vector<8x1xf32>
    %91 = vector.broadcast %90 : vector<8x1xf32> to vector<8x128xf32>
    %92 = arith.subf %86, %91 : vector<8x128xf32>
    %93 = arith.mulf %92, %92 : vector<8x128xf32>
    %cst_35 = arith.constant dense<0.000000e+00> : vector<8xf32>
    %94 = vector.multi_reduction <add>, %93, %cst_35 [1] : vector<8x128xf32> to vector<8xf32>
    %95 = vector.shape_cast %94 : vector<8xf32> to vector<8x1xf32>
    %cst_36 = arith.constant 1.280000e+02 : f32
    %96 = vector.broadcast %cst_36 : f32 to vector<8x1xf32>
    %97 = arith.divf %95, %96 : vector<8x1xf32>
    %98 = vector.broadcast %90 : vector<8x1xf32> to vector<8x128xf32>
    %99 = arith.subf %86, %98 : vector<8x128xf32>
    %cst_37 = arith.constant 9.99999974E-6 : f32
    %100 = vector.broadcast %cst_37 : f32 to vector<8x1xf32>
    %101 = arith.addf %97, %100 : vector<8x1xf32>
    %102 = math.rsqrt %101 : vector<8x1xf32>
    %103 = vector.broadcast %102 : vector<8x1xf32> to vector<8x128xf32>
    %104 = arith.mulf %99, %103 : vector<8x128xf32>
    %105 = vector.broadcast %7 : vector<1x128xf32> to vector<8x128xf32>
    %106 = arith.mulf %104, %105 : vector<8x128xf32>
    %107 = vector.broadcast %8 : vector<1x128xf32> to vector<8x128xf32>
    %108 = arith.addf %106, %107 : vector<8x128xf32>
    %cst_38 = arith.constant 5.000000e-01 : f32
    %109 = vector.broadcast %cst_38 : f32 to vector<8x128xf32>
    %110 = arith.mulf %109, %108 : vector<8x128xf32>
    %cst_39 = arith.constant 0.707106769 : f32
    %111 = vector.broadcast %cst_39 : f32 to vector<8x128xf32>
    %112 = arith.mulf %108, %111 : vector<8x128xf32>
    %113 = math.erf %112 : vector<8x128xf32>
    %cst_40 = arith.constant 1.000000e+00 : f32
    %114 = vector.broadcast %cst_40 : f32 to vector<8x128xf32>
    %115 = arith.addf %114, %113 : vector<8x128xf32>
    %116 = arith.mulf %110, %115 : vector<8x128xf32>
    %117 = vector.broadcast %9 : vector<1x128xf32> to vector<8x128xf32>
    %118 = arith.mulf %116, %117 : vector<8x128xf32>
    %cst_41 = arith.constant dense<0.000000e+00> : vector<8xf32>
    %119 = vector.multi_reduction <add>, %118, %cst_41 [1] : vector<8x128xf32> to vector<8xf32>
    %120 = vector.shape_cast %119 : vector<8xf32> to vector<8x1xf32>
    %121 = vector.broadcast %10 : vector<1x1xf32> to vector<8x1xf32>
    %122 = arith.addf %120, %121 : vector<8x1xf32>
    %c0_42 = arith.constant 0 : index
    %c0_43 = arith.constant 0 : index
    %123 = vector.load %arg3[%c0_42, %c0_43] : memref<8x1xf32, #tpu.memory_space<vmem>>, vector<8x1xf32>
    %cst_44 = arith.constant 0.000000e+00 : f32
    %124 = vector.broadcast %cst_44 : f32 to vector<8x1xf32>
    %125 = arith.maximumf %122, %124 : vector<8x1xf32>
    %126 = arith.mulf %122, %123 : vector<8x1xf32>
    %127 = arith.subf %125, %126 : vector<8x1xf32>
    %128 = math.absf %122 : vector<8x1xf32>
    %cst_45 = arith.constant 0.000000e+00 : f32
    %129 = vector.broadcast %cst_45 : f32 to vector<8x1xf32>
    %130 = arith.subf %129, %128 : vector<8x1xf32>
    %131 = math.exp %130 : vector<8x1xf32>
    %132 = math.log1p %131 : vector<8x1xf32>
    %133 = arith.addf %127, %132 : vector<8x1xf32>
    %134 = arith.negf %122 : vector<8x1xf32>
    %135 = math.exp %134 : vector<8x1xf32>
    %cst_46 = arith.constant 1.000000e+00 : f32
    %136 = vector.broadcast %cst_46 : f32 to vector<8x1xf32>
    %137 = arith.addf %136, %135 : vector<8x1xf32>
    %138 = arith.divf %136, %137 : vector<8x1xf32>
    %cst_47 = arith.constant 5.000000e-01 : f32
    %139 = vector.broadcast %cst_47 : f32 to vector<8x1xf32>
    %140 = arith.cmpf oge, %138, %139 : vector<8x1xf32>
    %141 = arith.extui %140 : vector<8x1xi1> to vector<8x1xi32>
    %142 = arith.sitofp %141 : vector<8x1xi32> to vector<8x1xf32>
    %143 = arith.cmpf oeq, %142, %123 : vector<8x1xf32>
    %144 = arith.extui %143 : vector<8x1xi1> to vector<8x1xi32>
    %145 = arith.sitofp %144 : vector<8x1xi32> to vector<8x1xf32>
    %146 = tpu.iota {dimensions = array<i32: 1>} : vector<8x128xi32>
    %c0_i32 = arith.constant 0 : i32
    %147 = vector.broadcast %c0_i32 : i32 to vector<8x128xi32>
    %148 = arith.cmpi eq, %146, %147 : vector<8x128xi32>
    %cst_48 = arith.constant 0.000000e+00 : f32
    %149 = vector.shape_cast %138 : vector<8x1xf32> to vector<8x1xf32>
    %150 = vector.broadcast %149 : vector<8x1xf32> to vector<8x128xf32>
    %151 = vector.broadcast %cst_48 : f32 to vector<8x128xf32>
    %152 = arith.select %148, %150, %151 : vector<8x128xi1>, vector<8x128xf32>
    %c1_i32 = arith.constant 1 : i32
    %153 = vector.broadcast %c1_i32 : i32 to vector<8x128xi32>
    %154 = arith.cmpi eq, %146, %153 : vector<8x128xi32>
    %155 = vector.shape_cast %133 : vector<8x1xf32> to vector<8x1xf32>
    %156 = vector.broadcast %155 : vector<8x1xf32> to vector<8x128xf32>
    %157 = arith.select %154, %156, %152 : vector<8x128xi1>, vector<8x128xf32>
    %c2_i32 = arith.constant 2 : i32
    %158 = vector.broadcast %c2_i32 : i32 to vector<8x128xi32>
    %159 = arith.cmpi eq, %146, %158 : vector<8x128xi32>
    %160 = vector.shape_cast %145 : vector<8x1xf32> to vector<8x1xf32>
    %161 = vector.broadcast %160 : vector<8x1xf32> to vector<8x128xf32>
    %162 = arith.select %159, %161, %157 : vector<8x128xi1>, vector<8x128xf32>
    %c0_49 = arith.constant 0 : index
    %c0_50 = arith.constant 0 : index
    %163 = vector.load %arg10[%c0_49, %c0_50] : memref<8x128xf32, #tpu.memory_space<vmem>>, vector<8x128xf32>
    tpu.vector_store %arg10[%c0_49, %c0_50], %162 {strides = array<i32>} : memref<8x128xf32, #tpu.memory_space<vmem>>, vector<8x128xf32>,
    return
  }
  func.func @transform_0(%arg0: i32) -> (i32, i32) {
    %c0_i32 = arith.constant 0 : i32
    %c0_i32_0 = arith.constant 0 : i32
    return %arg0, %c0_i32 : i32, i32
  }
  func.func @transform_1(%arg0: i32) -> (i32, i32) {
    %c0_i32 = arith.constant 0 : i32
    %c0_i32_0 = arith.constant 0 : i32
    return %arg0, %c0_i32 : i32, i32
  }
  func.func @transform_2(%arg0: i32) -> (i32, i32) {
    %c0_i32 = arith.constant 0 : i32
    %c0_i32_0 = arith.constant 0 : i32
    return %arg0, %c0_i32 : i32, i32
  }
  func.func @transform_3(%arg0: i32) -> (i32, i32) {
    %c0_i32 = arith.constant 0 : i32
    %c0_i32_0 = arith.constant 0 : i32
    %c0_i32_1 = arith.constant 0 : i32
    return %c0_i32, %c0_i32_0 : i32, i32
  }
  func.func @transform_4(%arg0: i32) -> (i32, i32) {
    %c0_i32 = arith.constant 0 : i32
    %c0_i32_0 = arith.constant 0 : i32
    %c0_i32_1 = arith.constant 0 : i32
    return %c0_i32, %c0_i32_0 : i32, i32
  }
  func.func @transform_5(%arg0: i32) -> (i32, i32) {
    %c0_i32 = arith.constant 0 : i32
    %c0_i32_0 = arith.constant 0 : i32
    %c0_i32_1 = arith.constant 0 : i32
    return %c0_i32, %c0_i32_0 : i32, i32
  }
  func.func @transform_6(%arg0: i32) -> (i32, i32) {
    %c0_i32 = arith.constant 0 : i32
    %c0_i32_0 = arith.constant 0 : i32
    %c0_i32_1 = arith.constant 0 : i32
    return %c0_i32, %c0_i32_0 : i32, i32
  }
  func.func @transform_7(%arg0: i32) -> (i32, i32) {
    %c0_i32 = arith.constant 0 : i32
    %c0_i32_0 = arith.constant 0 : i32
    %c0_i32_1 = arith.constant 0 : i32
    return %c0_i32, %c0_i32_0 : i32, i32
  }
  func.func @transform_8(%arg0: i32) -> (i32, i32) {
    %c0_i32 = arith.constant 0 : i32
    %c0_i32_0 = arith.constant 0 : i32
    %c0_i32_1 = arith.constant 0 : i32
    return %c0_i32, %c0_i32_0 : i32, i32
  }
  func.func @transform_9(%arg0: i32) -> (i32, i32) {
    %c0_i32 = arith.constant 0 : i32
    %c0_i32_0 = arith.constant 0 : i32
    return %arg0, %c0_i32 : i32, i32
  }
}

</mosaic_0001>

<bundles_post_ra>
// kernel: tpu_custom_call.1
= control target key start
LH: loop header
LB: loop body
LE: loop exit
PB: predicated region body
PF: predicated region fallthrough
CT: control target
= control target key end

     0   :  { %s4765_s0 = inlined_call_operand.hbm [shape: f32[256,1024], index: 0, kind: input, shape index: {}]   ;;  %s4766_s1 = inlined_call_operand.hbm [shape: f32[16,768], index: 1, kind: input, shape index: {}]   ;;  %s4767_s2 = inlined_call_operand.vmem [shape: f32[16,1], index: 2, kind: input, shape index: {}]   ;;  %s4768_s3 = inlined_call_operand.hbm [shape: bf16[1024,128], index: 3, kind: input, shape index: {}]   ;;  %s4769_s4 = inlined_call_operand.hbm [shape: bf16[768,128], index: 4, kind: input, shape index: {}]   ;;  %s4770_s5 = inlined_call_operand.hbm [shape: bf16[128,128], index: 5, kind: input, shape index: {}]   ;;  %s4771_s6 = inlined_call_operand.hbm [shape: bf16[128,128], index: 6, kind: input, shape index: {}]   ;;  %s4772_s7 = inlined_call_operand.hbm [shape: bf16[128,128], index: 7, kind: input, shape index: {}]   ;;  %s4773_s8 = inlined_call_operand.vmem [shape: f32[16,128], index: 8, kind: input, shape index: {}]   ;;  %s4774_s9 = inlined_call_operand.hbm [shape: f32[16,128], index: 9, kind: output, shape index: {}]  }
   0x1   :  { %4781 = sst [smem:[#allocation21_spill]] %s4765_s0 }
   0x2   :  { %4782 = sst [smem:[#allocation22_spill]] %s4768_s3 }
   0x3   :  { %4783 = sst [smem:[#allocation23_spill]] %s4769_s4 }
   0x4   :  { %4784 = sst [smem:[#allocation24_spill]] %s4770_s5 }
   0x5   :  { %4785 = sst [smem:[#allocation25_spill]] %s4771_s6 }
   0x6   :  { %4786 = sst [smem:[#allocation26_spill]] %s4772_s7 }
   0x7   :  { %4787 = sst [smem:[#allocation27_spill]] %s4774_s9 }
   0x8   :  { %14 = vsyncpa [#allocation3], 0 }
   0x9   :  { %16 = vsyncpa [#allocation3 + $0x1], 0 }
   0xa   :  { %17 = vsyncpa [#allocation6], 0 }
   0xb   :  { %19 = vsyncpa [#allocation6 + $0x1], 0 }
   0xc   :  { %20 = vsyncpa [#allocation9], 0 }
   0xd   :  { %21 = vsyncpa [#allocation12], 0 }
   0xe   :  { %22 = vsyncpa [#allocation4], 0 }
   0xf   :  { %24 = vsyncpa [#allocation4 + $0x1], 0  ;;  %s4085_s30 = smov 0   ;;  %s4087_s10 = smov 0  }
  0x10   :  { %s4089_s11 = smov 0   ;;  %s4091_s12 = smov 0  }
  0x11 LB: > { %s4021_s13 = smov [#allocation7]   ;;  %s4106_s15 = sadd.s32 4294967295, %s4019_s12   ;;  %s4019_s12 = sphi %s4091_s12, %s4819_s12   ;;  %s4015_s11 = sphi %s4089_s11, %s4818_s11   ;;  %s4011_s10 = sphi %s4087_s10, %s4817_s10   ;;  %s4007_s30 = sphi %s4085_s30, %s4816_s30  }
  0x12   : > { %s277_s14 = sshll.u32 %s4021_s13, 4  ;;  %p2893_p0 = scmp.ge.s32.totalorder %s4019_s12, 1  ;;  %s4111_s14 = int_to_ptr.vmem [resolvable:$true] %s277_s14 }
  0x13   : > { %p4776_p1 = scmp.eq.s32.totalorder %s4106_s15, 0  ;;  %p265_p2 = scmp.lt.s32.totalorder %s4019_s12, 3 }
  0x14   : > { %s4022_s17 = smov [#allocation8]   ;;  %s4023_s20 = smov [#allocation11]  }
  0x15   : > { %p4113_p3 = pnand %p2893_p0, %p265_p2  ;;  %s290_s18 = sshll.u32 %s4022_s17, 4  ;;  %s4126_s18 = int_to_ptr.vmem [resolvable:$true] %s290_s18 }
  0x16   : > { %s316_s21 = sshll.u32 %s4023_s20, 4  ;;  %s4790_s3 = sld [smem:[#allocation22_spill]]  ;;  %s4128_s21 = int_to_ptr.vmem [resolvable:$true] %s316_s21 }
  0x17   : > { %s4788_s16 = scalar_select %p4113_p3, 1, 0 }
  0x18   : > { %p3497_p5 = pneg %p4113_p3 }
  0x1a   : > { %p4122_p6 = pnand %p3497_p5, %p4776_p1 }
  0x1c   : > { %s3737_s24 = scalar_lea.hbm %s4790_s3, 8192  ;;  %p4138_p8 = pneg %p4122_p6 }
  0x1d   : > { %p3738_p7 = scmp.ne.s32.totalorder %s4790_s3, %s3737_s24  ;;  %p3744_p11 = scmp.lt.u32.totalorder %s3737_s24, %s4790_s3 }
  0x1f   : > { %p3740_p9 = pnand %p4138_p8, %p3738_p7 }
  0x21   : > { %p3741_p10 = pneg %p3740_p9 }
  0x23   : > { %p3746_p12 = pnand %p3744_p11, %p3741_p10 }
  0x25   : > { %3749 = shalt.err (!%p3746_p12)
}
  0x26   : > { %s3750_s13 = scalar_lea.vmem %s4111_s14, 8192  ;;  %p3758_p5 = scmp.lt.s32.totalorder %s4111_s14, %s4111_s14 }
  0x27   : > { %p3751_p13 = scmp.ne.s32.totalorder %s4111_s14, %s3750_s13  ;;  %p3759_p4 = scmp.lt.s32.totalorder %s3750_s13, %s3750_s13 }
  0x29   : > { %p3753_p0 = pnand %p3751_p13, %p4138_p8  ;;  %p3760_p7 = por %p3759_p4, %p3758_p5 }
  0x2b   : > { %p3754_p2 = pneg %p3753_p0 }
  0x2d   : > { %p3761_p9 = pnand %p3760_p7, %p3754_p2 }
  0x2f   : > { %3764 = shalt.err (!%p3761_p9)
}
  0x30   : > { %s4778_s17 = smov 64   ;;  %s4025_s20 = smov 4  }
  0x31   : > { %3500 = dma.hbm_to_vmem [thread:$0]  (!%p4122_p6), %s4790_s3, 8192, %s4111_s14, [#allocation6], %s4778_s17, %s4778_s17, %s4025_s20  }
  0x32   : > { %s4792_s4 = sld [smem:[#allocation23_spill]] }
  0x38   : > { %s3765_s26 = scalar_lea.hbm %s4792_s4, 6144 }
  0x39   : > { %p3766_p4 = scmp.ne.s32.totalorder %s4792_s4, %s3765_s26  ;;  %p3772_p12 = scmp.lt.u32.totalorder %s3765_s26, %s4792_s4 }
  0x3b   : > { %p3768_p10 = pnand %p3766_p4, %p4138_p8 }
  0x3d   : > { %p3769_p11 = pneg %p3768_p10 }
  0x3f   : > { %p3774_p13 = pnand %p3772_p12, %p3769_p11 }
  0x41   : > { %3777 = shalt.err (!%p3774_p13)
}
  0x42   : > { %s3778_s14 = scalar_lea.vmem %s4126_s18, 6144  ;;  %p3786_p7 = scmp.lt.s32.totalorder %s4126_s18, %s4126_s18 }
  0x43   : > { %p3779_p0 = scmp.ne.s32.totalorder %s4126_s18, %s3778_s14  ;;  %p3787_p9 = scmp.lt.s32.totalorder %s3778_s14, %s3778_s14 }
  0x45   : > { %p3781_p2 = pnand %p3779_p0, %p4138_p8  ;;  %p3788_p4 = por %p3787_p9, %p3786_p7 }
  0x47   : > { %p3782_p5 = pneg %p3781_p2 }
  0x49   : > { %p3789_p10 = pnand %p3788_p4, %p3782_p5 }
  0x4b   : > { %3792 = shalt.err (!%p3789_p10)
}
  0x4c   : > { %3503 = dma.hbm_to_vmem [thread:$0]  (!%p4122_p6), %s4792_s4, 6144, %s4126_s18, [#allocation9], %s4778_s17, %s4778_s17, %s4025_s20  }
  0x4d   : > { %s4793_s6 = sld [smem:[#allocation25_spill]] }
  0x53   : > { %s3793_s25 = scalar_lea.hbm %s4793_s6, 1024 }
  0x54   : > { %p3794_p11 = scmp.ne.s32.totalorder %s4793_s6, %s3793_s25  ;;  %p3800_p0 = scmp.lt.u32.totalorder %s3793_s25, %s4793_s6 }
  0x56   : > { %p3796_p12 = pnand %p3794_p11, %p4138_p8 }
  0x58   : > { %p3797_p13 = pneg %p3796_p12 }
  0x5a   : > { %p3802_p2 = pnand %p3800_p0, %p3797_p13 }
  0x5c   : > { %3805 = shalt.err (!%p3802_p2)
}
  0x5d   : > { %s3806_s18 = scalar_lea.vmem %s4128_s21, 1024  ;;  %p3814_p4 = scmp.lt.s32.totalorder %s4128_s21, %s4128_s21 }
  0x5e   : > { %p3807_p5 = scmp.ne.s32.totalorder %s4128_s21, %s3806_s18  ;;  %p3815_p10 = scmp.lt.s32.totalorder %s3806_s18, %s3806_s18 }
  0x60   : > { %p3809_p7 = pnand %p3807_p5, %p4138_p8  ;;  %p3816_p11 = por %p3815_p10, %p3814_p4 }
  0x62   : > { %p3810_p9 = pneg %p3809_p7 }
  0x64   : > { %p3817_p12 = pnand %p3816_p11, %p3810_p9 }
  0x66   : > { %3820 = shalt.err (!%p3817_p12)
}
  0x67   : > { %3509 = dma.hbm_to_vmem [thread:$0]  (!%p4122_p6), %s4793_s6, 1024, %s4128_s21, [#allocation12], %s4778_s17, %s4778_s17, %s4025_s20  }
  0x68   : > { %s4026_s22 = smov [#allocation10]   ;;  %s4027_s24 = smov [#allocation13]  }
  0x69   : > { %s303_s23 = sshll.u32 %s4026_s22, 4  ;;  %s329_s25 = sshll.u32 %s4027_s24, 4  ;;  %s304_s23 = int_to_ptr.vmem [resolvable:$true] %s303_s23  ;;  %s330_s25 = int_to_ptr.vmem [resolvable:$true] %s329_s25 }
  0x6a   : > { %s4794_s5 = sld [smem:[#allocation24_spill]] }
  0x70   : > { %s3821_s29 = scalar_lea.hbm %s4794_s5, 1024 }
  0x71   : > { %p3822_p13 = scmp.ne.s32.totalorder %s4794_s5, %s3821_s29  ;;  %p3828_p5 = scmp.lt.u32.totalorder %s3821_s29, %s4794_s5 }
  0x73   : > { %p3824_p0 = pnand %p3822_p13, %p4138_p8 }
  0x75   : > { %p3825_p2 = pneg %p3824_p0 }
  0x77   : > { %p3830_p7 = pnand %p3828_p5, %p3825_p2 }
  0x79   : > { %3833 = shalt.err (!%p3830_p7)
}
  0x7a   : > { %s3834_s21 = scalar_lea.vmem %s304_s23, 1024  ;;  %p3842_p11 = scmp.lt.s32.totalorder %s304_s23, %s304_s23 }
  0x7b   : > { %p3835_p9 = scmp.ne.s32.totalorder %s304_s23, %s3834_s21  ;;  %p3843_p12 = scmp.lt.s32.totalorder %s3834_s21, %s3834_s21 }
  0x7d   : > { %p3837_p4 = pnand %p3835_p9, %p4138_p8  ;;  %p3844_p1 = por %p3843_p12, %p3842_p11 }
  0x7f   : > { %p3838_p10 = pneg %p3837_p4 }
  0x81   : > { %p3845_p3 = pnand %p3844_p1, %p3838_p10 }
  0x83   : > { %3848 = shalt.err (!%p3845_p3)
}
  0x84   : > { %3506 = dma.hbm_to_vmem [thread:$0]  (!%p4122_p6), %s4794_s5, 1024, %s304_s23, [#allocation9], %s4778_s17, %s4778_s17, %s4025_s20  }
  0x85   : > { %s4795_s7 = sld [smem:[#allocation26_spill]] }
  0x8b   : > { %s3849_s26 = scalar_lea.hbm %s4795_s7, 1024 }
  0x8c   : > { %p3850_p1 = scmp.ne.s32.totalorder %s4795_s7, %s3849_s26  ;;  %p3856_p0 = scmp.lt.u32.totalorder %s3849_s26, %s4795_s7 }
  0x8e   : > { %p3852_p3 = pnand %p3850_p1, %p4138_p8 }
  0x90   : > { %p3853_p13 = pneg %p3852_p3 }
  0x92   : > { %p3858_p2 = pnand %p3856_p0, %p3853_p13 }
  0x94   : > { %3861 = shalt.err (!%p3858_p2)
}
  0x95   : > { %s3862_s14 = scalar_lea.vmem %s330_s25, 1024  ;;  %p3870_p4 = scmp.lt.s32.totalorder %s330_s25, %s330_s25 }
  0x96   : > { %p3863_p5 = scmp.ne.s32.totalorder %s330_s25, %s3862_s14  ;;  %p3871_p10 = scmp.lt.s32.totalorder %s3862_s14, %s3862_s14 }
  0x98   : > { %p3865_p7 = pnand %p3863_p5, %p4138_p8  ;;  %p3872_p11 = por %p3871_p10, %p3870_p4 }
  0x9a   : > { %p3866_p9 = pneg %p3865_p7 }
  0x9c   : > { %p3873_p12 = pnand %p3872_p11, %p3866_p9 }
  0x9e   : > { %3876 = shalt.err (!%p3873_p12)
}
  0x9f   : > { %3512 = dma.hbm_to_vmem [thread:$0]  (!%p4122_p6), %s4795_s7, 1024, %s330_s25, [#allocation12], %s4778_s17, %s4778_s17, %s4025_s20  }
  0xa0   : > { %s2892_s19 = sadd.s32 4294967294, %s4019_s12   ;;  %s4258_s27 = sadd.s32 1, %s4019_s12  }
  0xa1   : > { %s37_s3 = sadd.s32 1, %s4015_s11  ;;  %s34_s9 = ssub.s32 %s4019_s12, %s4258_s27 }
  0xa2   : > { %p44_p8 = scmp.ne.s32.totalorder %s4015_s11, %s4011_s10  ;;  %p35_p1 = scmp.eq.s32.totalorder %s34_s9, 0 }
  0xa3   : > { %p45_p3 = scmp.eq.s32.totalorder %s4019_s12, 0  ;;  %p50_p13 = scmp.ne.s32.totalorder %s4011_s10, %s4007_s30 }
  0xa4   : > { %p252_p0 = scmp.eq.s32.totalorder %s4106_s15, 1  ;;  %p4796_p5 = scmp.eq.s32.totalorder %s4106_s15, 0 }
  0xa5   : > { %s4270_s22 = scalar_select %p35_p1, %s4015_s11, %s37_s3  }
  0xa6   : > { %p46_p2 = por %p45_p3, %p44_p8  ;;  %p4274_p7 = por %p4796_p5, %p50_p13 }
  0xa7   : > { %p4278_p6 = por %p252_p0, %p44_p8  ;;  %p258_p9 = scmp.eq.s32.totalorder %s2892_s19, 1 }
  0xa8   : > { %s4797_s20 = scalar_select %p4274_p7, 1, 0 }
  0xa9   : > { %s4798_s25 = scalar_select %p4278_p6, 1, 0 }
  0xaa   : > { %p3529_p4 = scmp.lt.s32.totalorder %s4019_s12, 2  ;;  %s4284_s24 = sand.u32 1, %s4015_s11  }
  0xab   : > { %p4286_p10 = por %p258_p9, %p50_p13  ;;  %s2900_s28 = sshll.u32 %s4284_s24, 10 }
  0xac   : > { %s3058_s29 = sshll.u32 %s4019_s12, 14  ;;  %s4800_s0 = sld [smem:[#allocation21_spill]] }
  0xad   : > { %s4799_s26 = scalar_select %p4286_p10, 1, 0 }
  0xae   : > { %s350_s23 = scalar_lea.vmem [#allocation2], %s2900_s28  ;;  %p4297_p11 = pnand %p3529_p4, %p46_p2 }
  0xaf   : > { %s358_s21 = sshll.u32 %s350_s23, 4  ;;  %s347_s9 = scalar_lea.sflag [#allocation3], %s4284_s24  ;;  %s4301_s21 = int_to_ptr.vmem [resolvable:$true] %s358_s21 }
  0xb0   : > { %p3879_p8 = pneg %p4297_p11 }
  0xb2   : > { %s4295_s14 = scalar_lea.hbm %s4800_s0, %s3058_s29  ;;  %s3882_s13 = scalar_lea.hbm %s4800_s0, 32768 }
  0xb3   : > { %s3877_s17 = scalar_lea.hbm %s4295_s14, 16384  ;;  %p3883_p13 = scmp.lt.u32.totalorder %s4295_s14, %s4800_s0 }
  0xb4   : > { %p3878_p12 = scmp.ne.s32.totalorder %s4295_s14, %s3877_s17  ;;  %p3884_p0 = scmp.lt.u32.totalorder %s3882_s13, %s3877_s17 }
  0xb5   : > { %p3886_p5 = scmp.lt.u32.totalorder %s3877_s17, %s4295_s14 }
  0xb6   : > { %p3880_p1 = pnand %p3879_p8, %p3878_p12  ;;  %p3885_p2 = por %p3884_p0, %p3883_p13 }
  0xb8   : > { %p3881_p3 = pneg %p3880_p1  ;;  %p3887_p9 = por %p3886_p5, %p3885_p2 }
  0xba   : > { %p3888_p4 = pnand %p3887_p9, %p3881_p3 }
  0xbc   : > { %3891 = shalt.err (!%p3888_p4)
}
  0xbd   : > { %s3892_s3 = scalar_lea.vmem %s4301_s21, 16384  ;;  %s4028_s28 = smov [#allocation2]  }
  0xbe   : > { %p3893_p12 = scmp.ne.s32.totalorder %s4301_s21, %s3892_s3  ;;  %s3897_s29 = sshll.u32 %s4028_s28, 4  ;;  %s3898_s29 = int_to_ptr.vmem [resolvable:$false] %s3897_s29 }
  0xbf   : > { %s3899_s18 = scalar_lea.vmem %s3898_s29, 32768  ;;  %p3900_p6 = scmp.lt.s32.totalorder %s4301_s21, %s3898_s29 }
  0xc0   : > { %p3895_p1 = pnand %p3893_p12, %p3879_p8  ;;  %p3901_p13 = scmp.lt.s32.totalorder %s3899_s18, %s3892_s3 }
  0xc2   : > { %p3896_p10 = pneg %p3895_p1  ;;  %p3902_p0 = por %p3901_p13, %p3900_p6 }
  0xc4   : > { %p3903_p2 = pnand %p3902_p0, %p3896_p10 }
  0xc6   : > { %3906 = shalt.err (!%p3903_p2)
}
  0xc7   : > { %s4029_s17 = smov 1024   ;;  %s4802_s13 = smov 64  }
  0xc8   : > { %3516 = dma.hbm_to_vmem [thread:$0]  (!%p4297_p11), %s4295_s14, 16384, %s4301_s21, %s347_s9, %s4029_s17, %s4029_s17, %s4802_s13  }
  0xc9   : > { %s3468_s23 = smul.u32 48, %s4284_s24  ;;  %s4803_s5 = sand.u32 1, %s4019_s12  }
  0xca   : > { %s3469_s28 = smul.u32 768, %s4019_s12  ;;  %s369_s6 = scalar_lea.sflag [#allocation6], %s4803_s5 }
  0xcb   : > { %s372_s0 = scalar_lea.vmem [#allocation5], %s3468_s23  ;;  %s3912_s21 = scalar_lea.hbm %s4766_s1, 1536 }
  0xcc   : > { %s4338_s18 = scalar_lea.hbm %s4766_s1, %s3469_s28  ;;  %s380_s4 = sshll.u32 %s372_s0, 4  ;;  %s381_s4 = int_to_ptr.vmem [resolvable:$true] %s380_s4 }
  0xcd   : > { %s3907_s7 = scalar_lea.hbm %s4338_s18, 768  ;;  %p3913_p5 = scmp.lt.u32.totalorder %s4338_s18, %s4766_s1 }
  0xce   : > { %p3908_p6 = scmp.ne.s32.totalorder %s4338_s18, %s3907_s7  ;;  %p3914_p9 = scmp.lt.u32.totalorder %s3912_s21, %s3907_s7 }
  0xcf   : > { %p3916_p12 = scmp.lt.u32.totalorder %s3907_s7, %s4338_s18 }
  0xd0   : > { %p3910_p10 = pnand %p3908_p6, %p3879_p8  ;;  %p3915_p4 = por %p3914_p9, %p3913_p5 }
  0xd2   : > { %p3911_p3 = pneg %p3910_p10  ;;  %p3917_p1 = por %p3916_p12, %p3915_p4 }
  0xd4   : > { %p3918_p13 = pnand %p3917_p1, %p3911_p3 }
  0xd6   : > { %3921 = shalt.err (!%p3918_p13)
}
  0xd7   : > { %s3922_s0 = scalar_lea.vmem %s381_s4, 768  ;;  %s4030_s5 = smov [#allocation5]  }
  0xd8   : > { %p3923_p0 = scmp.ne.s32.totalorder %s381_s4, %s3922_s0  ;;  %s3927_s13 = sshll.u32 %s4030_s5, 4  ;;  %s3928_s13 = int_to_ptr.vmem [resolvable:$false] %s3927_s13 }
  0xd9   : > { %s3929_s23 = scalar_lea.vmem %s3928_s13, 1536  ;;  %p3930_p10 = scmp.lt.s32.totalorder %s381_s4, %s3928_s13 }
  0xda   : > { %p3925_p2 = pnand %p3923_p0, %p3879_p8  ;;  %p3931_p7 = scmp.lt.s32.totalorder %s3929_s23, %s3922_s0 }
  0xdc   : > { %p3926_p6 = pneg %p3925_p2  ;;  %p3932_p5 = por %p3931_p7, %p3930_p10 }
  0xde   : > { %p3933_p9 = pnand %p3932_p5, %p3926_p6 }
  0xe0   : > { %3936 = shalt.err (!%p3933_p9)
}
  0xe1   : > { %3519 = dma.hbm_to_vmem [thread:$0]  (!%p4297_p11), %s4338_s18, 768, %s381_s4, %s369_s6  }
  0xe2   : > { %p4804_p3 = scmp.ne.s32.totalorder %s4788_s16, 0 }
  0xe3   : > { %s4364_s7 = sand.u32 (!%p4804_p3), 1, %s4011_s10   ;;  %p4805_p7 = scmp.ne.s32.totalorder (!%p4804_p3), %s4797_s20, 0 }
  0xe4   : > { %396 = sbr.rel (%p4804_p3) target bundleno = 2235 (0x8bb), region = 56  ;;  %s2906_s28 = sshll.u32 (!%p4804_p3), %s4364_s7, 10 }
  0xe5   : > { %s399_s29 = scalar_lea.sflag (!%p4804_p3), [#allocation3], %s4364_s7  ;;  %s4368_s3 = scalar_lea.vmem (!%p4804_p3), [#allocation2], %s2906_s28 }
  0xeb   : > { %3982 = dma.done.wait (%p4805_p7), %s399_s29, 16384  }
  0xec   : > { %3984 = vsyncadd (%p4805_p7), %s399_s29, 4294950912  ;;  %s407_s4 = sand.u32 1, %s4106_s15   ;;  %s3470_s6 = smul.u32 48, %s4364_s7 }
  0xed   : > { %s408_s16 = scalar_lea.sflag [#allocation6], %s407_s4 }
  0xee   : > { %s4376_s19 = scalar_lea.vmem [#allocation5], %s3470_s6 }
  0xef   : > { %3986 = dma.done.wait (%p4805_p7), %s408_s16, 768  }
  0xf0   : > { %3988 = vsyncadd (%p4805_p7), %s408_s16, 4294966528  ;;  %p4806_p11 = scmp.eq.s32.totalorder %s4106_s15, 0 }
  0xf2   : > { %3990 = dma.done.wait (%p4806_p11), [#allocation6], 8192   ;;  %p4807_p8 = pmov %p4806_p11 }
  0xf4   : > { %3992 = vsyncadd (%p4807_p8), [#allocation6], 4294959104  ;;  %p4808_p4 = pmov %p4807_p8 }
  0xf6   : > { %3994 = dma.done.wait (%p4808_p4), [#allocation9], 7168   ;;  %p4809_p12 = pmov %p4808_p4 }
  0xf7   : > { %p4810_p1 = pmov %p4808_p4 }
  0xf8   : > { %3996 = vsyncadd (%p4809_p12), [#allocation9], 4294960128 }
  0xf9   : > { %3998 = dma.done.wait (%p4810_p1), [#allocation12], 2048   ;;  %p4811_p13 = pmov %p4810_p1 }
  0xfa   : > { %v3581_v0 = vld [vmem:[#allocation7 + $0x40] sm:$0xff]   ;;  %v3585_v4 = vld [vmem:[#allocation7 + $0x48] sm:$0xff]   ;;  %v3589_v8 = vld [vmem:[#allocation7 + $0x50] sm:$0xff]   ;;  %vm1669_vm0 = vcmask 1041409   ;;  %vm1672_vm1 = vcmask 1042434   ;;  %vm1675_vm2 = vcmask 1043459  }
  0xfb   : > { %4000 = vsyncadd (%p4811_p13), [#allocation12], 4294965248  ;;  %v3582_v1 = vld [vmem:[#allocation7 + $0xc0] sm:$0xff]   ;;  %3059 = vmatprep.subr.bf16.mxu0 %v3581_v0  ;;  %v3586_v5 = vld [vmem:[#allocation7 + $0xc8] sm:$0xff]   ;;  %vm1678_vm3 = vcmask 1044484   ;;  %vm1681_vm4 = vcmask 1045509  }
  0xfc   : > { %v3583_v2 = vld [vmem:[#allocation7] sm:$0xff]   ;;  %3123 = vmatprep.subr.bf16.mxu1 %v3582_v1  ;;  %v3587_v6 = vld [vmem:[#allocation7 + $0x8] sm:$0xff]   ;;  %v3590_v9 = vld [vmem:[#allocation7 + $0xd0] sm:$0xff]   ;;  %vm1684_vm5 = vcmask 1046534   ;;  %vm1687_vm6 = vcmask 1047559   ;;  %vm4032_vm7 = vmmov 0  }
  0xfd   : > { %v3584_v3 = vld [vmem:[#allocation7 + $0x80] sm:$0xff]   ;;  %3060 = vmatpush3.bf16.msra.mxu0 %v3583_v2  ;;  %v3588_v7 = vld [vmem:[#allocation7 + $0x88] sm:$0xff]   ;;  %v3591_v10 = vld [vmem:[#allocation7 + $0x10] sm:$0xff]   ;;  %p476_p0 = scmp.lt.s32.totalorder %s4106_s15, 1  ;;  %s2912_s13 = sshll.u32 %s4364_s7, 3 }
  0xfe   : > { %3124 = vmatpush3.bf16.msra.mxu1 %v3584_v3  ;;  %3061 = vmatprep.subr.bf16.mxu0 %v3585_v4  ;;  %v3592_v11 = vld [vmem:[#allocation7 + $0x90] sm:$0xff]   ;;  %v3593_v12 = vld [vmem:[#allocation7 + $0x58] sm:$0xff]   ;;  %v3597_v16 = vld [vmem:[#allocation7 + $0x60] sm:$0xff]   ;;  %s3054_s23 = sshll.u32 %s4106_s15, 7  ;;  %s474_s28 = scalar_lea.vmem [#allocation14], %s2912_s13 }
  0xff   : > { %3125 = vmatprep.subr.bf16.mxu1 %v3586_v5  ;;  %v3594_v13 = vld [vmem:[#allocation7 + $0xd8] sm:$0xff]   ;;  %v3598_v17 = vld [vmem:[#allocation7 + $0xe0] sm:$0xff]   ;;  %v3601_v20 = vld [vmem:[#allocation7 + $0x68] sm:$0xff]   ;;  %s477_s21 = scalar_select %p476_p0, %s4106_s15, 1 }
 0x100   : > { %v3595_v14 = vld [vmem:[#allocation7 + $0x18] sm:$0xff]   ;;  %v3599_v18 = vld [vmem:[#allocation7 + $0x20] sm:$0xff]   ;;  %v3602_v21 = vld [vmem:[#allocation7 + $0xe8] sm:$0xff]   ;;  %s2740_s29 = sshll.u32 %s474_s28, 4  ;;  %s4812_s6 = sld [smem:[#allocation27_spill]]  ;;  %s4723_s29 = int_to_ptr.vmem [resolvable:$true] %s2740_s29 }
 0x101   : > { %3062 = vmatpush3.bf16.msra.mxu0 %v3587_v6  ;;  %v3596_v15 = vld [vmem:[#allocation7 + $0x98] sm:$0xff]   ;;  %v3600_v19 = vld [vmem:[#allocation7 + $0xa0] sm:$0xff]   ;;  %v3603_v22 = vld [vmem:[#allocation7 + $0x28] sm:$0xff]   ;;  %s2913_s9 = sshll.u32 %s477_s21, 3  ;;  %s2727_s15 = scalar_lea.sflag [#allocation4], %s4364_s7 }
 0x102   : > { %3126 = vmatpush3.bf16.msra.mxu1 %v3588_v7  ;;  %3063 = vmatprep.subr.bf16.mxu0 %v3589_v8  ;;  %v3604_v23 = vld [vmem:[#allocation7 + $0xa8] sm:$0xff]   ;;  %v3605_v24 = vld [vmem:[#allocation7 + $0x70] sm:$0xff]   ;;  %v3609_v28 = vld [vmem:[#allocation7 + $0x78] sm:$0xff]   ;;  %s479_s5 = scalar_lea.vmem %s4767_s2, %s2913_s9  ;;  %p4813_p6 = scmp.ne.s32.totalorder %s4798_s25, 0 }
 0x103   : > { %3127 = vmatprep.subr.bf16.mxu1 %v3590_v9  ;;  %v3606_v25 = vld [vmem:[#allocation7 + $0xf0] sm:$0xff]   ;;  %v3610_v29 = vld [vmem:[#allocation7 + $0xf8] sm:$0xff]   ;;  %v484_v32 = vld [vmem:[%s4368_s3 + $0x8] sm:$0xff]  ;;  %s4034_s20 = smov [#allocation14]  }
 0x104   : > { %v3607_v26 = vld [vmem:[#allocation7 + $0x30] sm:$0xff]   ;;  %v3611_v30 = vld [vmem:[#allocation7 + $0x38] sm:$0xff]   ;;  %v492_v33 = vld [vmem:[%s4368_s3 + $0x48] sm:$0xff]  ;;  %s3941_s18 = sshll.u32 %s4034_s20, 4  ;;  %s3942_s18 = int_to_ptr.vmem [resolvable:$false] %s3941_s18 }
 0x105   : > { %3064 = vmatpush3.bf16.msra.mxu0 %v3591_v10  ;;  %v3608_v27 = vld [vmem:[#allocation7 + $0xb0] sm:$0xff]   ;;  %v3612_v31 = vld [vmem:[#allocation7 + $0xb8] sm:$0xff]   ;;  %v612_v35 = vpack.c.bf16 %v492_v33, %v484_v32  ;;  %v483_v37 = vld [vmem:[%s4368_s3] sm:$0xff]  ;;  %s3943_s24 = scalar_lea.vmem %s3942_s18, 256  ;;  %p3944_p9 = scmp.lt.s32.totalorder %s4723_s29, %s3942_s18 }
 0x106   : > { %3128 = vmatpush3.bf16.msra.mxu1 %v3592_v11  ;;  %3065 = vmatprep.subr.bf16.mxu0 %v3593_v12  ;;  %v486_v34 = vld [vmem:[%s4368_s3 + $0x18] sm:$0xff]  ;;  %v491_v38 = vld [vmem:[%s4368_s3 + $0x40] sm:$0xff]  ;;  %v485_v41 = vld [vmem:[%s4368_s3 + $0x10] sm:$0xff]  ;;  %s4721_s16 = scalar_lea.hbm %s4812_s6, %s3054_s23 }
 0x107   : > { %3129 = vmatprep.subr.bf16.mxu1 %v3594_v13  ;;  %v494_v36 = vld [vmem:[%s4368_s3 + $0x58] sm:$0xff]  ;;  %v611_v40 = vpack.c.bf16 %v491_v38, %v483_v37  ;;  %v493_v42 = vld [vmem:[%s4368_s3 + $0x50] sm:$0xff]  ;;  %1219 = vmatprep.mubr.bf16.mxu0 %v612_v35  ;;  %v3613_v44 = vld [vmem:[#allocation7 + $0x140] sm:$0xff]  }
 0x108   : > { %v614_v39 = vpack.c.bf16 %v494_v36, %v486_v34  ;;  %v613_v43 = vpack.c.bf16 %v493_v42, %v485_v41  ;;  %v3614_v45 = vld [vmem:[#allocation7 + $0x100] sm:$0xff]   ;;  %v500_v48 = vld [vmem:[%s4368_s3 + $0x88] sm:$0xff]  ;;  %v502_v50 = vld [vmem:[%s4368_s3 + $0x98] sm:$0xff] }
 0x109   : > { %3066 = vmatpush3.bf16.msra.mxu0 %v3595_v14  ;;  %v3615_v46 = vld [vmem:[#allocation7 + $0x1c0] sm:$0xff]   ;;  %v508_v49 = vld [vmem:[%s4368_s3 + $0xc8] sm:$0xff]  ;;  %v510_v51 = vld [vmem:[%s4368_s3 + $0xd8] sm:$0xff] }
 0x10a   : > { %3130 = vmatpush3.bf16.msra.mxu1 %v3596_v15  ;;  %3067 = vmatprep.subr.bf16.mxu0 %v3597_v16  ;;  %v3616_v47 = vld [vmem:[#allocation7 + $0x180] sm:$0xff]   ;;  %v620_v52 = vpack.c.bf16 %v508_v49, %v500_v48  ;;  %v622_v53 = vpack.c.bf16 %v510_v51, %v502_v50  ;;  %v501_v56 = vld [vmem:[%s4368_s3 + $0x90] sm:$0xff]  ;;  %v3617_v60 = vld [vmem:[#allocation7 + $0x148] sm:$0xff]  }
 0x10b   : > { %3131 = vmatprep.subr.bf16.mxu1 %v3598_v17  ;;  %1316 = vmatprep.mubr.bf16.mxu1 %v614_v39  ;;  %v499_v54 = vld [vmem:[%s4368_s3 + $0x80] sm:$0xff]  ;;  %v509_v58 = vld [vmem:[%s4368_s3 + $0xd0] sm:$0xff]  ;;  %v3618_v61 = vld [vmem:[#allocation7 + $0x108] sm:$0xff]  }
 0x10c   : > { %v507_v55 = vld [vmem:[%s4368_s3 + $0xc0] sm:$0xff]  ;;  %v621_v59 = vpack.c.bf16 %v509_v58, %v501_v56  ;;  %v3619_v62 = vld [vmem:[#allocation7 + $0x1c8] sm:$0xff]   ;;  %v518_v3 = vld [vmem:[%s4368_s3 + $0x118] sm:$0xff] }
 0x10d   : > { %3068 = vmatpush3.bf16.msra.mxu0 %v3599_v18  ;;  %v619_v57 = vpack.c.bf16 %v507_v55, %v499_v54  ;;  %v3620_v63 = vld [vmem:[#allocation7 + $0x188] sm:$0xff]   ;;  %v526_v4 = vld [vmem:[%s4368_s3 + $0x158] sm:$0xff]  ;;  %v515_v5 = vld [vmem:[%s4368_s3 + $0x100] sm:$0xff] }
 0x10e   : > { %3132 = vmatpush3.bf16.msra.mxu1 %v3600_v19  ;;  %3069 = vmatprep.subr.bf16.mxu0 %v3601_v20  ;;  %v516_v0 = vld [vmem:[%s4368_s3 + $0x108] sm:$0xff]  ;;  %v630_v6 = vpack.c.bf16 %v526_v4, %v518_v3  ;;  %v523_v7 = vld [vmem:[%s4368_s3 + $0x140] sm:$0xff]  ;;  %v517_v8 = vld [vmem:[%s4368_s3 + $0x110] sm:$0xff] }
 0x10f   : > { %3133 = vmatprep.subr.bf16.mxu1 %v3602_v21  ;;  %v524_v1 = vld [vmem:[%s4368_s3 + $0x148] sm:$0xff]  ;;  %v525_v9 = vld [vmem:[%s4368_s3 + $0x150] sm:$0xff]  ;;  %v627_v10 = vpack.c.bf16 %v523_v7, %v515_v5  ;;  %v534_v18 = vld [vmem:[%s4368_s3 + $0x198] sm:$0xff] }
 0x110   : > { %v628_v2 = vpack.c.bf16 %v524_v1, %v516_v0  ;;  %v3621_v11 = vld [vmem:[#allocation7 + $0x150] sm:$0xff]   ;;  %v629_v12 = vpack.c.bf16 %v525_v9, %v517_v8  ;;  %v532_v16 = vld [vmem:[%s4368_s3 + $0x188] sm:$0xff]  ;;  %v542_v20 = vld [vmem:[%s4368_s3 + $0x1d8] sm:$0xff] }
 0x111   : > { %3070 = vmatpush3.bf16.msra.mxu0 %v3603_v22  ;;  %v3622_v13 = vld [vmem:[#allocation7 + $0x110] sm:$0xff]   ;;  %v540_v17 = vld [vmem:[%s4368_s3 + $0x1c8] sm:$0xff]  ;;  %v531_v21 = vld [vmem:[%s4368_s3 + $0x180] sm:$0xff] }
 0x112   : > { %3134 = vmatpush3.bf16.msra.mxu1 %v3604_v23  ;;  %3071 = vmatprep.subr.bf16.mxu0 %v3605_v24  ;;  %v3623_v14 = vld [vmem:[#allocation7 + $0x1d0] sm:$0xff]   ;;  %v636_v19 = vpack.c.bf16 %v540_v17, %v532_v16  ;;  %v539_v22 = vld [vmem:[%s4368_s3 + $0x1c0] sm:$0xff]  ;;  %v638_v23 = vpack.c.bf16 %v542_v20, %v534_v18  ;;  %v548_v32 = vld [vmem:[%s4368_s3 + $0x208] sm:$0xff] }
 0x113   : > { %3135 = vmatprep.subr.bf16.mxu1 %v3606_v25  ;;  %v3624_v15 = vld [vmem:[#allocation7 + $0x190] sm:$0xff]   ;;  %v556_v33 = vld [vmem:[%s4368_s3 + $0x248] sm:$0xff]  ;;  %v550_v34 = vld [vmem:[%s4368_s3 + $0x218] sm:$0xff] }
 0x114   : > { %v533_v24 = vld [vmem:[%s4368_s3 + $0x190] sm:$0xff]  ;;  %v558_v35 = vld [vmem:[%s4368_s3 + $0x258] sm:$0xff]  ;;  %v644_v36 = vpack.c.bf16 %v556_v33, %v548_v32  ;;  %v547_v38 = vld [vmem:[%s4368_s3 + $0x200] sm:$0xff] }
 0x115   : > { %3072 = vmatpush3.bf16.msra.mxu0 %v3607_v26  ;;  %v541_v25 = vld [vmem:[%s4368_s3 + $0x1d0] sm:$0xff]  ;;  %v3625_v26 = vld [vmem:[#allocation7 + $0x158] sm:$0xff]   ;;  %v646_v37 = vpack.c.bf16 %v558_v35, %v550_v34  ;;  %v555_v39 = vld [vmem:[%s4368_s3 + $0x240] sm:$0xff] }
 0x116   : > { %3136 = vmatpush3.bf16.msra.mxu1 %v3608_v27  ;;  %3073 = vmatprep.subr.bf16.mxu0 %v3609_v28  ;;  %v635_v27 = vpack.c.bf16 %v539_v22, %v531_v21  ;;  %v3626_v28 = vld [vmem:[#allocation7 + $0x118] sm:$0xff]   ;;  %v557_v41 = vld [vmem:[%s4368_s3 + $0x250] sm:$0xff]  ;;  %v3629_v42 = vld [vmem:[#allocation7 + $0x160] sm:$0xff]  }
 0x117   : > { %3137 = vmatprep.subr.bf16.mxu1 %v3610_v29  ;;  %v637_v29 = vpack.c.bf16 %v541_v25, %v533_v24  ;;  %v564_v48 = vld [vmem:[%s4368_s3 + $0x288] sm:$0xff]  ;;  %v566_v51 = vld [vmem:[%s4368_s3 + $0x298] sm:$0xff]  ;;  %v563_v54 = vld [vmem:[%s4368_s3 + $0x280] sm:$0xff] }
 0x118   : > { %v572_v49 = vld [vmem:[%s4368_s3 + $0x2c8] sm:$0xff]  ;;  %v571_v55 = vld [vmem:[%s4368_s3 + $0x2c0] sm:$0xff]  ;;  %v565_v56 = vld [vmem:[%s4368_s3 + $0x290] sm:$0xff] }
 0x119   : > { %3074 = vmatpush3.bf16.msra.mxu0 %v3611_v30  ;;  %v3627_v30 = vld [vmem:[#allocation7 + $0x1d8] sm:$0xff]   ;;  %v652_v50 = vpack.c.bf16 %v572_v49, %v564_v48  ;;  %v3633_v58 = vld [vmem:[#allocation7 + $0x168] sm:$0xff]   ;;  %v587_v7 = vld [vmem:[%s4368_s3 + $0x340] sm:$0xff] }
 0x11a   : > { %3138 = vmatpush3.bf16.msra.mxu1 %v3612_v31  ;;  %3187 = vmatprep.subr.bf16.mxu0 %v3613_v44  ;;  %v3628_v31 = vld [vmem:[#allocation7 + $0x198] sm:$0xff]   ;;  %v643_v44 = vpack.c.bf16 %v555_v39, %v547_v38  ;;  %v588_v0 = vld [vmem:[%s4368_s3 + $0x348] sm:$0xff]  ;;  %v3637_v8 = vld [vmem:[#allocation7 + $0x170] sm:$0xff]  }
 0x11b   : > { %3251 = vmatprep.subr.bf16.mxu1 %v3615_v46  ;;  %v582_v1 = vld [vmem:[%s4368_s3 + $0x318] sm:$0xff]  ;;  %v581_v9 = vld [vmem:[%s4368_s3 + $0x310] sm:$0xff]  ;;  %v3645_v35 = vld [vmem:[#allocation8 + $0x40] sm:$0xff]  }
 0x11c   : > { %1220 = vmatmul.mubr.bf16.vlgmr.msra.gmra.mrb[0].mxu0 %v611_v40  ;;  %v549_v40 = vld [vmem:[%s4368_s3 + $0x210] sm:$0xff]  ;;  %v590_v4 = vld [vmem:[%s4368_s3 + $0x358] sm:$0xff]  ;;  %v487_v39 = vld [vmem:[%s4368_s3 + $0x20] sm:$0xff] }
 0x11d   : > { %1317 = vmatmul.mubr.bf16.vlgmr.msra.gmra.mrb[0].mxu1 %v613_v43  ;;  %3188 = vmatpush3.bf16.msra.mxu0 %v3614_v45  ;;  %v3630_v43 = vld [vmem:[#allocation7 + $0x120] sm:$0xff]   ;;  %v645_v46 = vpack.c.bf16 %v557_v41, %v549_v40  ;;  %v662_v5 = vpack.c.bf16 %v590_v4, %v582_v1  ;;  %v598_v16 = vld [vmem:[%s4368_s3 + $0x398] sm:$0xff]  ;;  %v489_v41 = vld [vmem:[%s4368_s3 + $0x30] sm:$0xff] }
 0x11e   : > { %3252 = vmatpush3.bf16.msra.mxu1 %v3616_v47  ;;  %1227 = vmatprep.mubr.bf16.mxu0 %v620_v52  ;;  %v3631_v45 = vld [vmem:[#allocation7 + $0x1e0] sm:$0xff]   ;;  %v574_v52 = vld [vmem:[%s4368_s3 + $0x2d8] sm:$0xff]  ;;  %v3650_v4 = vld [vmem:[#allocation8 + $0x10] sm:$0xff]  }
 0x11f   : > { %1324 = vmatprep.mubr.bf16.mxu1 %v622_v53  ;;  %3189 = vmatprep.subr.bf16.mxu0 %v3617_v60  ;;  %v3632_v47 = vld [vmem:[#allocation7 + $0x1a0] sm:$0xff]   ;;  %v654_v53 = vpack.c.bf16 %v574_v52, %v566_v51  ;;  %v3635_v60 = vld [vmem:[#allocation7 + $0x1e8] sm:$0xff]   ;;  %v606_v17 = vld [vmem:[%s4368_s3 + $0x3d8] sm:$0xff] }
 0x120   : > { %3253 = vmatprep.subr.bf16.mxu1 %v3619_v62  ;;  %v651_v62 = vpack.c.bf16 %v571_v55, %v563_v54  ;;  %v670_v21 = vpack.c.bf16 %v606_v17, %v598_v16  ;;  %v3641_v22 = vld [vmem:[#allocation7 + $0x178] sm:$0xff]   ;;  %v495_v40 = vld [vmem:[%s4368_s3 + $0x60] sm:$0xff]  ;;  %v3647_v54 = vld [vmem:[#allocation8 + $0x48] sm:$0xff]  }
 0x121   : > { %3190 = vmatpush3.bf16.msra.mxu0 %v3618_v61  ;;  %v3636_v61 = vld [vmem:[#allocation7 + $0x1a8] sm:$0xff]   ;;  %v3642_v24 = vld [vmem:[#allocation7 + $0x138] sm:$0xff]   ;;  %v3646_v49 = vld [vmem:[#allocation8] sm:$0xff]  }
 0x122   : > { %3254 = vmatpush3.bf16.msra.mxu1 %v3620_v63  ;;  %3191 = vmatprep.subr.bf16.mxu0 %v3621_v11  ;;  %v580_v63 = vld [vmem:[%s4368_s3 + $0x308] sm:$0xff]  ;;  %v3638_v11 = vld [vmem:[#allocation7 + $0x130] sm:$0xff]   ;;  %v3643_v25 = vld [vmem:[#allocation7 + $0x1f8] sm:$0xff]  }
 0x123   : > { %3255 = vmatprep.subr.bf16.mxu1 %v3623_v14  ;;  %v660_v3 = vpack.c.bf16 %v588_v0, %v580_v63  ;;  %v596_v14 = vld [vmem:[%s4368_s3 + $0x388] sm:$0xff]  ;;  %v490_v32 = vld [vmem:[%s4368_s3 + $0x38] sm:$0xff]  ;;  %v503_v52 = vld [vmem:[%s4368_s3 + $0xa0] sm:$0xff] }
 0x124   : > { %1228 = vmatmul.mubr.bf16.gmra.mrb[4].mxu0 %v619_v57  ;;  %v573_v57 = vld [vmem:[%s4368_s3 + $0x2d0] sm:$0xff]  ;;  %v498_v33 = vld [vmem:[%s4368_s3 + $0x78] sm:$0xff]  ;;  %v3653_v0 = vld [vmem:[#allocation8 + $0xc0] sm:$0xff]  }
 0x125   : > { %1325 = vmatmul.mubr.bf16.gmra.mrb[4].mxu1 %v621_v59  ;;  %1235 = vmatprep.mubr.bf16.mxu0 %v628_v2  ;;  %v3634_v59 = vld [vmem:[#allocation7 + $0x128] sm:$0xff]   ;;  %v653_v2 = vpack.c.bf16 %v573_v57, %v565_v56  ;;  %v618_v38 = vpack.c.bf16 %v498_v33, %v490_v32  ;;  %v505_v55 = vld [vmem:[%s4368_s3 + $0xb0] sm:$0xff]  ;;  %v3655_v16 = vld [vmem:[#allocation8 + $0x60] sm:$0xff]  }
 0x126   : > { %1332 = vmatprep.mubr.bf16.mxu1 %v630_v6  ;;  %3192 = vmatpush3.bf16.msra.mxu0 %v3622_v13  ;;  %v579_v6 = vld [vmem:[%s4368_s3 + $0x300] sm:$0xff]  ;;  %v3640_v13 = vld [vmem:[#allocation7 + $0x1b0] sm:$0xff]   ;;  %v3648_v57 = vld [vmem:[#allocation8 + $0x8] sm:$0xff]  }
 0x127   : > { %3256 = vmatpush3.bf16.msra.mxu1 %v3624_v15  ;;  %3193 = vmatprep.subr.bf16.mxu0 %v3625_v26  ;;  %v604_v15 = vld [vmem:[%s4368_s3 + $0x3c8] sm:$0xff]  ;;  %v659_v18 = vpack.c.bf16 %v587_v7, %v579_v6  ;;  %v603_v26 = vld [vmem:[%s4368_s3 + $0x3c0] sm:$0xff]  ;;  %v513_v56 = vld [vmem:[%s4368_s3 + $0xf0] sm:$0xff] }
 0x128   : > { %3257 = vmatprep.subr.bf16.mxu1 %v3627_v30  ;;  %v668_v20 = vpack.c.bf16 %v604_v15, %v596_v14  ;;  %v488_v30 = vld [vmem:[%s4368_s3 + $0x28] sm:$0xff]  ;;  %v625_v1 = vpack.c.bf16 %v513_v56, %v505_v55  ;;  %v527_v6 = vld [vmem:[%s4368_s3 + $0x160] sm:$0xff]  ;;  %v3651_v7 = vld [vmem:[#allocation8 + $0x58] sm:$0xff]  }
 0x129   : > { %v546_v14 = vld [vmem:[%s4368_s3 + $0x1f8] sm:$0xff]  ;;  %v3657_v17 = vld [vmem:[#allocation8 + $0xc8] sm:$0xff]   ;;  %v3661_v32 = vld [vmem:[#allocation8 + $0xd0] sm:$0xff]  }
 0x12a   : > { %3194 = vmatpush3.bf16.msra.mxu0 %v3626_v28  ;;  %v3644_v28 = vld [vmem:[#allocation7 + $0x1b8] sm:$0xff]  }
 0x12b   : > { %3258 = vmatpush3.bf16.msra.mxu1 %v3628_v31  ;;  %3195 = vmatprep.subr.bf16.mxu0 %v3629_v42  ;;  %v496_v31 = vld [vmem:[%s4368_s3 + $0x68] sm:$0xff]  ;;  %v497_v42 = vld [vmem:[%s4368_s3 + $0x70] sm:$0xff]  ;;  %v3652_v15 = vld [vmem:[#allocation8 + $0x18] sm:$0xff]  }
 0x12c   : > { %1236 = vmatmul.mubr.bf16.gmra.mrb[8].mxu0 %v627_v10  ;;  %3259 = vmatprep.subr.bf16.mxu1 %v3631_v45  ;;  %v589_v10 = vld [vmem:[%s4368_s3 + $0x350] sm:$0xff]  ;;  %v506_v45 = vld [vmem:[%s4368_s3 + $0xb8] sm:$0xff]  ;;  %v617_v48 = vpack.c.bf16 %v497_v42, %v489_v41  ;;  %v551_v41 = vld [vmem:[%s4368_s3 + $0x220] sm:$0xff] }
 0x12d   : > { %1333 = vmatmul.mubr.bf16.gmra.mrb[8].mxu1 %v629_v12  ;;  %1243 = vmatprep.mubr.bf16.mxu0 %v636_v19  ;;  %v3639_v12 = vld [vmem:[#allocation7 + $0x1f0] sm:$0xff]   ;;  %v661_v19 = vpack.c.bf16 %v589_v10, %v581_v9  ;;  %v554_v33 = vld [vmem:[%s4368_s3 + $0x238] sm:$0xff]  ;;  %v559_v42 = vld [vmem:[%s4368_s3 + $0x260] sm:$0xff] }
 0x12e   : > { %1340 = vmatprep.mubr.bf16.mxu1 %v638_v23  ;;  %3196 = vmatpush3.bf16.msra.mxu0 %v3630_v43  ;;  %v595_v23 = vld [vmem:[%s4368_s3 + $0x380] sm:$0xff]  ;;  %v504_v43 = vld [vmem:[%s4368_s3 + $0xa8] sm:$0xff]  ;;  %v521_v9 = vld [vmem:[%s4368_s3 + $0x130] sm:$0xff] }
 0x12f   : > { %3260 = vmatpush3.bf16.msra.mxu1 %v3632_v47  ;;  %3197 = vmatprep.subr.bf16.mxu0 %v3633_v58  ;;  %v667_v34 = vpack.c.bf16 %v603_v26, %v595_v23  ;;  %v615_v47 = vpack.c.bf16 %v495_v40, %v487_v39  ;;  %v520_v58 = vld [vmem:[%s4368_s3 + $0x128] sm:$0xff]  ;;  %v529_v10 = vld [vmem:[%s4368_s3 + $0x170] sm:$0xff]  ;;  %v3656_v23 = vld [vmem:[#allocation8 + $0x20] sm:$0xff]  }
 0x130   : > { %3261 = vmatprep.subr.bf16.mxu1 %v3635_v60  ;;  %v522_v60 = vld [vmem:[%s4368_s3 + $0x138] sm:$0xff]  ;;  %v537_v26 = vld [vmem:[%s4368_s3 + $0x1b0] sm:$0xff] }
 0x131   : > { %v3663_v39 = vld [vmem:[#allocation8 + $0xd8] sm:$0xff]  }
 0x132   : > { %3198 = vmatpush3.bf16.msra.mxu0 %v3634_v59  ;;  %v528_v59 = vld [vmem:[%s4368_s3 + $0x168] sm:$0xff] }
 0x133   : > { %3262 = vmatpush3.bf16.msra.mxu1 %v3636_v61  ;;  %3199 = vmatprep.subr.bf16.mxu0 %v3637_v8  ;;  %v3649_v61 = vld [vmem:[#allocation8 + $0x50] sm:$0xff]   ;;  %v3654_v8 = vld [vmem:[#allocation8 + $0x80] sm:$0xff]  }
 0x134   : > { %1244 = vmatmul.mubr.bf16.gmra.mrb[12].mxu0 %v635_v27  ;;  %3263 = vmatprep.subr.bf16.mxu1 %v3639_v12  ;;  %v597_v27 = vld [vmem:[%s4368_s3 + $0x390] sm:$0xff]  ;;  %v544_v12 = vld [vmem:[%s4368_s3 + $0x1e8] sm:$0xff] }
 0x135   : > { %1341 = vmatmul.mubr.bf16.gmra.mrb[12].mxu1 %v637_v29  ;;  %1251 = vmatprep.mubr.bf16.mxu0 %v644_v36  ;;  %v605_v29 = vld [vmem:[%s4368_s3 + $0x3d0] sm:$0xff] }
 0x136   : > { %1348 = vmatprep.mubr.bf16.mxu1 %v646_v37  ;;  %3200 = vmatpush3.bf16.msra.mxu0 %v3638_v11  ;;  %v669_v36 = vpack.c.bf16 %v605_v29, %v597_v27  ;;  %v616_v37 = vpack.c.bf16 %v496_v31, %v488_v30  ;;  %v536_v11 = vld [vmem:[%s4368_s3 + $0x1a8] sm:$0xff]  ;;  %v545_v27 = vld [vmem:[%s4368_s3 + $0x1f0] sm:$0xff] }
 0x137   : > { %3264 = vmatpush3.bf16.msra.mxu1 %v3640_v13  ;;  %3201 = vmatprep.subr.bf16.mxu0 %v3641_v22  ;;  %v538_v13 = vld [vmem:[%s4368_s3 + $0x1b8] sm:$0xff]  ;;  %v560_v29 = vld [vmem:[%s4368_s3 + $0x268] sm:$0xff] }
 0x138   : > { %3265 = vmatprep.subr.bf16.mxu1 %v3643_v25  ;;  %v642_v22 = vpack.c.bf16 %v546_v14, %v538_v13  ;;  %v543_v25 = vld [vmem:[%s4368_s3 + $0x1e0] sm:$0xff]  ;;  %v3659_v30 = vld [vmem:[#allocation8 + $0x68] sm:$0xff]  }
 0x139   : > { %v3660_v31 = vld [vmem:[#allocation8 + $0x28] sm:$0xff]   ;;  %v3676_v13 = vld [vmem:[#allocation8 + $0x140] sm:$0xff]  }
 0x13a   : > { %3202 = vmatpush3.bf16.msra.mxu0 %v3642_v24  ;;  %v535_v24 = vld [vmem:[%s4368_s3 + $0x1a0] sm:$0xff] }
 0x13b   : > { %3266 = vmatpush3.bf16.msra.mxu1 %v3644_v28  ;;  %3315 = vmatprep.subr.bf16.mxu0 %v3645_v35  ;;  %v552_v28 = vld [vmem:[%s4368_s3 + $0x228] sm:$0xff]  ;;  %v3662_v35 = vld [vmem:[#allocation8 + $0x90] sm:$0xff]   ;;  %v583_v14 = vld [vmem:[%s4368_s3 + $0x320] sm:$0xff] }
 0x13c   : > { %1252 = vmatmul.mubr.bf16.gmra.mrb[16].mxu0 %v643_v44  ;;  %v512_v44 = vld [vmem:[%s4368_s3 + $0xe8] sm:$0xff]  ;;  %3337 = vmatprep.subr.bf16.mxu1 %v3653_v0 }
 0x13d   : > { %1349 = vmatmul.mubr.bf16.gmra.mrb[16].mxu1 %v645_v46  ;;  %1259 = vmatprep.mubr.bf16.mxu0 %v652_v50  ;;  %v514_v46 = vld [vmem:[%s4368_s3 + $0xf8] sm:$0xff]  ;;  %v624_v50 = vpack.c.bf16 %v512_v44, %v504_v43  ;;  %v553_v44 = vld [vmem:[%s4368_s3 + $0x230] sm:$0xff]  ;;  %v592_v0 = vld [vmem:[%s4368_s3 + $0x368] sm:$0xff] }
 0x13e   : > { %1356 = vmatprep.mubr.bf16.mxu1 %v654_v53  ;;  %v626_v51 = vpack.c.bf16 %v514_v46, %v506_v45  ;;  %v511_v53 = vld [vmem:[%s4368_s3 + $0xe0] sm:$0xff]  ;;  %v3664_v43 = vld [vmem:[#allocation8 + $0x98] sm:$0xff]   ;;  %v561_v45 = vld [vmem:[%s4368_s3 + $0x270] sm:$0xff] }
 0x13f   : > { %v623_v63 = vpack.c.bf16 %v511_v53, %v503_v52  ;;  %v568_v46 = vld [vmem:[%s4368_s3 + $0x2a8] sm:$0xff]  ;;  %v3667_v52 = vld [vmem:[#allocation8 + $0xe0] sm:$0xff]   ;;  %v649_v55 = vpack.c.bf16 %v561_v45, %v553_v44 }
 0x140   : > { %v3668_v53 = vld [vmem:[#allocation8 + $0xa0] sm:$0xff]   ;;  %v3680_v45 = vld [vmem:[#allocation8 + $0x108] sm:$0xff]  }
 0x144   : > { %1260 = vmatmul.mubr.bf16.gmra.mrb[20].mxu0 %v651_v62  ;;  %v530_v62 = vld [vmem:[%s4368_s3 + $0x178] sm:$0xff] }
 0x145   : > { %1357 = vmatmul.mubr.bf16.gmra.mrb[20].mxu1 %v653_v2  ;;  %1267 = vmatprep.mubr.bf16.mxu0 %v660_v3  ;;  %v632_v2 = vpack.c.bf16 %v528_v59, %v520_v58  ;;  %v634_v3 = vpack.c.bf16 %v530_v62, %v522_v60  ;;  %v3669_v58 = vld [vmem:[#allocation8 + $0xe8] sm:$0xff]   ;;  %v567_v59 = vld [vmem:[%s4368_s3 + $0x2a0] sm:$0xff]  ;;  %v577_v62 = vld [vmem:[%s4368_s3 + $0x2f0] sm:$0xff] }
 0x146   : > { %1364 = vmatprep.mubr.bf16.mxu1 %v662_v5  ;;  %v519_v5 = vld [vmem:[%s4368_s3 + $0x120] sm:$0xff] }
 0x147   : > { %v575_v60 = vld [vmem:[%s4368_s3 + $0x2e0] sm:$0xff] }
 0x14c   : > { %1268 = vmatmul.mubr.bf16.gmra.mrb[24].mxu0 %v659_v18  ;;  %v631_v18 = vpack.c.bf16 %v527_v6, %v519_v5  ;;  %v3672_v5 = vld [vmem:[#allocation8 + $0x38] sm:$0xff]   ;;  %v3673_v6 = vld [vmem:[#allocation8 + $0xf0] sm:$0xff]  }
 0x14d   : > { %1365 = vmatmul.mubr.bf16.gmra.mrb[24].mxu1 %v661_v19  ;;  %1275 = vmatprep.mubr.bf16.mxu0 %v668_v20  ;;  %v633_v19 = vpack.c.bf16 %v529_v10, %v521_v9  ;;  %v640_v20 = vpack.c.bf16 %v544_v12, %v536_v11  ;;  %v3675_v11 = vld [vmem:[#allocation8 + $0xf8] sm:$0xff]  }
 0x14e   : > { %1372 = vmatprep.mubr.bf16.mxu1 %v670_v21  ;;  %v3658_v21 = vld [vmem:[#allocation8 + $0x88] sm:$0xff]  }
 0x154   : > { %1276 = vmatmul.mubr.bf16.gmra.mrb[28].mxu0 %v667_v34  ;;  %v562_v34 = vld [vmem:[%s4368_s3 + $0x278] sm:$0xff] }
 0x155   : > { %1373 = vmatmul.mubr.bf16.gmra.mrb[28].mxu1 %v669_v36  ;;  %1413 = vmatprep.mubr.bf16.mxu0 %v616_v37  ;;  %v639_v36 = vpack.c.bf16 %v543_v25, %v535_v24  ;;  %v641_v37 = vpack.c.bf16 %v545_v27, %v537_v26  ;;  %v650_v40 = vpack.c.bf16 %v562_v34, %v554_v33  ;;  %v599_v27 = vld [vmem:[%s4368_s3 + $0x3a0] sm:$0xff] }
 0x156   : > { %1510 = vmatprep.mubr.bf16.mxu1 %v618_v38  ;;  %v648_v38 = vpack.c.bf16 %v560_v29, %v552_v28  ;;  %v607_v28 = vld [vmem:[%s4368_s3 + $0x3e0] sm:$0xff]  ;;  %v601_v29 = vld [vmem:[%s4368_s3 + $0x3b0] sm:$0xff] }
 0x157   : > { %v671_v33 = vpack.c.bf16 %v607_v28, %v599_v27 }
 0x15c   : > { %1414 = vmatmul.mubr.bf16.vlgmr.msra.gmra.mrb[32].mxu0 %v615_v47  ;;  %v576_v47 = vld [vmem:[%s4368_s3 + $0x2e8] sm:$0xff] }
 0x15d   : > { %1511 = vmatmul.mubr.bf16.vlgmr.msra.gmra.mrb[32].mxu1 %v617_v48  ;;  %3316 = vmatpush3.bf16.msra.mxu0 %v3646_v49  ;;  %v3665_v48 = vld [vmem:[#allocation8 + $0x70] sm:$0xff]   ;;  %v570_v49 = vld [vmem:[%s4368_s3 + $0x2b8] sm:$0xff]  ;;  %v656_v56 = vpack.c.bf16 %v576_v47, %v568_v46 }
 0x15e   : > { %1421 = vmatprep.mubr.bf16.mxu0 %v624_v50  ;;  %1518 = vmatprep.mubr.bf16.mxu1 %v626_v51  ;;  %v578_v50 = vld [vmem:[%s4368_s3 + $0x2f8] sm:$0xff]  ;;  %v3666_v51 = vld [vmem:[#allocation8 + $0x30] sm:$0xff]  }
 0x15f   : > { %3317 = vmatprep.subr.bf16.mxu0 %v3647_v54  ;;  %3338 = vmatpush3.bf16.msra.mxu1 %v3654_v8  ;;  %v647_v54 = vpack.c.bf16 %v559_v42, %v551_v41  ;;  %v3674_v8 = vld [vmem:[#allocation8 + $0xb0] sm:$0xff]   ;;  %v3679_v42 = vld [vmem:[#allocation8 + $0x148] sm:$0xff]  }
 0x160   : > { %3339 = vmatprep.subr.bf16.mxu1 %v3657_v17  ;;  %v3677_v17 = vld [vmem:[#allocation8 + $0xb8] sm:$0xff]   ;;  %v3681_v46 = vld [vmem:[#allocation8 + $0x150] sm:$0xff]  }
 0x161   : > { %3318 = vmatpush3.bf16.msra.mxu0 %v3648_v57  ;;  %v658_v57 = vpack.c.bf16 %v578_v50, %v570_v49  ;;  %v3682_v47 = vld [vmem:[#allocation8 + $0x110] sm:$0xff]   ;;  %v3684_v49 = vld [vmem:[#allocation8 + $0x118] sm:$0xff]   ;;  %v3685_v50 = vld [vmem:[#allocation8 + $0x160] sm:$0xff]  }
 0x162   : > { %3319 = vmatprep.subr.bf16.mxu0 %v3649_v61  ;;  %v569_v61 = vld [vmem:[%s4368_s3 + $0x2b0] sm:$0xff] }
 0x163   : > { %3340 = vmatpush3.bf16.msra.mxu1 %v3658_v21  ;;  %v657_v9 = vpack.c.bf16 %v577_v62, %v569_v61  ;;  %v602_v21 = vld [vmem:[%s4368_s3 + $0x3b8] sm:$0xff] }
 0x164   : > { %1422 = vmatmul.mubr.bf16.gmra.mrb[36].mxu0 %v623_v63  ;;  %3341 = vmatprep.subr.bf16.mxu1 %v3661_v32  ;;  %v584_v63 = vld [vmem:[%s4368_s3 + $0x328] sm:$0xff] }
 0x165   : > { %1519 = vmatmul.mubr.bf16.gmra.mrb[36].mxu1 %v625_v1  ;;  %1429 = vmatprep.mubr.bf16.mxu0 %v632_v2  ;;  %v3670_v1 = vld [vmem:[#allocation8 + $0xa8] sm:$0xff]   ;;  %v586_v2 = vld [vmem:[%s4368_s3 + $0x338] sm:$0xff]  ;;  %v664_v10 = vpack.c.bf16 %v592_v0, %v584_v63 }
 0x166   : > { %1526 = vmatprep.mubr.bf16.mxu1 %v634_v3  ;;  %3320 = vmatpush3.bf16.msra.mxu0 %v3650_v4  ;;  %v594_v3 = vld [vmem:[%s4368_s3 + $0x378] sm:$0xff] }
 0x167   : > { %3321 = vmatprep.subr.bf16.mxu0 %v3651_v7  ;;  %3342 = vmatpush3.bf16.msra.mxu1 %v3662_v35  ;;  %v3671_v4 = vld [vmem:[#allocation8 + $0x78] sm:$0xff]   ;;  %v655_v7 = vpack.c.bf16 %v575_v60, %v567_v59  ;;  %v666_v12 = vpack.c.bf16 %v594_v3, %v586_v2 }
 0x168   : > { %3343 = vmatprep.subr.bf16.mxu1 %v3663_v39  ;;  %v1721_v32 = vld [vmem:[%s4376_s19 + $0x18] sm:$0xff]  ;;  %v1723_v39 = vld [vmem:[%s4376_s19 + $0x28] sm:$0xff] }
 0x169   : > { %v1729_v44 = vpack.c.bf16 %v1723_v39, %v1723_v39 }
 0x16a   : > { %3322 = vmatpush3.bf16.msra.mxu0 %v3652_v15  ;;  %v591_v15 = vld [vmem:[%s4368_s3 + $0x360] sm:$0xff] }
 0x16b   : > { %3323 = vmatprep.subr.bf16.mxu0 %v3655_v16  ;;  %3344 = vmatpush3.bf16.msra.mxu1 %v3664_v43  ;;  %v585_v16 = vld [vmem:[%s4368_s3 + $0x330] sm:$0xff] }
 0x16c   : > { %1430 = vmatmul.mubr.bf16.gmra.mrb[40].mxu0 %v631_v18  ;;  %3345 = vmatprep.subr.bf16.mxu1 %v3667_v52  ;;  %v593_v18 = vld [vmem:[%s4368_s3 + $0x370] sm:$0xff]  ;;  %v3687_v52 = vld [vmem:[#allocation8 + $0x168] sm:$0xff]  }
 0x16d   : > { %1527 = vmatmul.mubr.bf16.gmra.mrb[40].mxu1 %v633_v19  ;;  %1437 = vmatprep.mubr.bf16.mxu0 %v640_v20  ;;  %v600_v19 = vld [vmem:[%s4368_s3 + $0x3a8] sm:$0xff]  ;;  %v665_v24 = vpack.c.bf16 %v593_v18, %v585_v16 }
 0x16e   : > { %1534 = vmatprep.mubr.bf16.mxu1 %v642_v22  ;;  %3324 = vmatpush3.bf16.msra.mxu0 %v3656_v23  ;;  %v608_v20 = vld [vmem:[%s4368_s3 + $0x3e8] sm:$0xff]  ;;  %v610_v22 = vld [vmem:[%s4368_s3 + $0x3f8] sm:$0xff]  ;;  %v663_v23 = vpack.c.bf16 %v591_v15, %v583_v14 }
 0x16f   : > { %3325 = vmatprep.subr.bf16.mxu0 %v3659_v30  ;;  %3346 = vmatpush3.bf16.msra.mxu1 %v3668_v53  ;;  %v672_v25 = vpack.c.bf16 %v608_v20, %v600_v19  ;;  %v674_v26 = vpack.c.bf16 %v610_v22, %v602_v21  ;;  %v609_v30 = vld [vmem:[%s4368_s3 + $0x3f0] sm:$0xff]  ;;  %v3688_v53 = vld [vmem:[#allocation8 + $0x128] sm:$0xff]  }
 0x170   : > { %3347 = vmatprep.subr.bf16.mxu1 %v3669_v58  ;;  %v673_v34 = vpack.c.bf16 %v609_v30, %v601_v29  ;;  %v1722_v58 = vld [vmem:[%s4376_s19 + $0x20] sm:$0xff] }
 0x171   : > { %v1728_v59 = vpack.c.bf16 %v1722_v58, %v1722_v58 }
 0x172   : > { %3326 = vmatpush3.bf16.msra.mxu0 %v3660_v31  ;;  %v1719_v31 = vld [vmem:[%s4376_s19 + $0x8] sm:$0xff] }
 0x173   : > { %3327 = vmatprep.subr.bf16.mxu0 %v3665_v48  ;;  %3348 = vmatpush3.bf16.msra.mxu1 %v3670_v1  ;;  %v1725_v35 = vpack.c.bf16 %v1719_v31, %v1719_v31  ;;  %v3683_v48 = vld [vmem:[#allocation8 + $0x158] sm:$0xff]  }
 0x174   : > { %1438 = vmatmul.mubr.bf16.gmra.mrb[44].mxu0 %v639_v36  ;;  %3349 = vmatprep.subr.bf16.mxu1 %v3673_v6  ;;  %v1727_v36 = vpack.c.bf16 %v1721_v32, %v1721_v32 }
 0x175   : > { %1535 = vmatmul.mubr.bf16.gmra.mrb[44].mxu1 %v641_v37  ;;  %1445 = vmatprep.mubr.bf16.mxu0 %v648_v38  ;;  %v1718_v37 = vld [vmem:[%s4376_s19] sm:$0xff]  ;;  %v1720_v38 = vld [vmem:[%s4376_s19 + $0x10] sm:$0xff]  ;;  %s3937_s19 = scalar_lea.vmem %s4723_s29, 128 }
 0x176   : > { %1542 = vmatprep.mubr.bf16.mxu1 %v650_v40  ;;  %3328 = vmatpush3.bf16.msra.mxu0 %v3666_v51  ;;  %v3678_v40 = vld [vmem:[#allocation8 + $0x100] sm:$0xff]   ;;  %v1724_v41 = vpack.c.bf16 %v1718_v37, %v1718_v37  ;;  %v1726_v43 = vpack.c.bf16 %v1720_v38, %v1720_v38  ;;  %p3938_p2 = scmp.ne.s32.totalorder %s4723_s29, %s3937_s19  ;;  %p3945_p3 = scmp.lt.s32.totalorder %s3943_s24, %s3937_s19 }
 0x177   : > { %3329 = vmatprep.subr.bf16.mxu0 %v3671_v4  ;;  %3350 = vmatpush3.bf16.msra.mxu1 %v3674_v8  ;;  %v3686_v51 = vld [vmem:[#allocation8 + $0x120] sm:$0xff]  }
 0x178   : > { %3351 = vmatprep.subr.bf16.mxu1 %v3675_v11  ;;  %p3939_p10 = pnand %p3938_p2, %p4813_p6  ;;  %p3946_p7 = por %p3945_p3, %p3944_p9 }
 0x17a   : > { %3330 = vmatpush3.bf16.msra.mxu0 %v3672_v5  ;;  %p3940_p5 = pneg %p3939_p10 }
 0x17b   : > { %3359 = vmatprep.subr.bf16.mxu0 %v3676_v13  ;;  %3352 = vmatpush3.bf16.msra.mxu1 %v3677_v17 }
 0x17c   : > { %1446 = vmatmul.mubr.bf16.gmra.mrb[48].mxu0 %v647_v54  ;;  %v3689_v54 = vld [vmem:[#allocation8 + $0x170] sm:$0xff]   ;;  %p3947_p11 = pnand %p3946_p7, %p3940_p5 }
 0x17d   : > { %1543 = vmatmul.mubr.bf16.gmra.mrb[48].mxu1 %v649_v55  ;;  %1453 = vmatprep.mubr.bf16.mxu0 %v656_v56  ;;  %v3690_v55 = vld [vmem:[#allocation8 + $0x130] sm:$0xff]   ;;  %v3691_v56 = vld [vmem:[#allocation8 + $0x178] sm:$0xff]  }
 0x17e   : > { %1550 = vmatprep.mubr.bf16.mxu1 %v658_v57  ;;  %v3692_v57 = vld [vmem:[#allocation8 + $0x138] sm:$0xff]  }
 0x184   : > { %1454 = vmatmul.mubr.bf16.gmra.mrb[52].mxu0 %v655_v7 }
 0x185   : > { %1551 = vmatmul.mubr.bf16.gmra.mrb[52].mxu1 %v657_v9  ;;  %1461 = vmatprep.mubr.bf16.mxu0 %v664_v10 }
 0x186   : > { %1558 = vmatprep.mubr.bf16.mxu1 %v666_v12 }
 0x18c   : > { %1462 = vmatmul.mubr.bf16.gmra.mrb[56].mxu0 %v663_v23 }
 0x18d   : > { %1559 = vmatmul.mubr.bf16.gmra.mrb[56].mxu1 %v665_v24  ;;  %1469 = vmatprep.mubr.bf16.mxu0 %v672_v25 }
 0x18e   : > { %1566 = vmatprep.mubr.bf16.mxu1 %v674_v26 }
 0x194   : > { %1470 = vmatmul.mubr.bf16.gmra.mrb[60].mxu0 %v671_v33 }
 0x195   : > { %1567 = vmatmul.mubr.bf16.gmra.mrb[60].mxu1 %v673_v34  ;;  %2150 = vmatprep.mubr.bf16.mxu0 %v1725_v35 }
 0x196   : > { %2190 = vmatprep.mubr.bf16.mxu1 %v1727_v36 }
 0x19c   : > { %2151 = vmatmul.mubr.bf16.vlgmr.msra.gmra.mrb[64].mxu0 %v1724_v41 }
 0x19d   : > { %3360 = vmatpush3.bf16.msra.mxu0 %v3678_v40  ;;  %2191 = vmatmul.mubr.bf16.vlgmr.msra.gmra.mrb[64].mxu1 %v1726_v43 }
 0x19e   : > { %3361 = vmatprep.subr.bf16.mxu0 %v3679_v42  ;;  %2230 = vmatprep.mubr.bf16.mxu0 %v1729_v44 }
 0x1a1   : > { %3362 = vmatpush3.bf16.msra.mxu0 %v3680_v45 }
 0x1a2   : > { %3363 = vmatprep.subr.bf16.mxu0 %v3681_v46 }
 0x1a5   : > { %3364 = vmatpush3.bf16.msra.mxu0 %v3682_v47 }
 0x1a6   : > { %3365 = vmatprep.subr.bf16.mxu0 %v3683_v48 }
 0x1a9   : > { %3366 = vmatpush3.bf16.msra.mxu0 %v3684_v49 }
 0x1aa   : > { %3367 = vmatprep.subr.bf16.mxu0 %v3685_v50 }
 0x1ad   : > { %3368 = vmatpush3.bf16.msra.mxu0 %v3686_v51 }
 0x1ae   : > { %3369 = vmatprep.subr.bf16.mxu0 %v3687_v52 }
 0x1b1   : > { %3370 = vmatpush3.bf16.msra.mxu0 %v3688_v53 }
 0x1b2   : > { %3371 = vmatprep.subr.bf16.mxu0 %v3689_v54 }
 0x1b5   : > { %3372 = vmatpush3.bf16.msra.mxu0 %v3690_v55 }
 0x1b6   : > { %3373 = vmatprep.subr.bf16.mxu0 %v3691_v56 }
 0x1b9   : > { %3374 = vmatpush3.bf16.msra.mxu0 %v3692_v57 }
 0x1bc   : > { %2231 = vmatmul.mubr.bf16.vlgmr.msra.gmra.mrb[68].mxu0 %v1728_v59 }
 0x1ef   : > { %v3075_v60 = vpop.f32.mrb[0].mxu0 }
 0x1f0   : > { %v3139_v61 = vpop.f32.mrb[0].mxu1  ;;  %v3076_v62 = vpop.f32.mrb[1].mxu0 }
 0x1f1   : > { %v3077_v63 = vadd.f32 %v3076_v62, %v3075_v60  ;;  %v3140_v0 = vpop.f32.mrb[1].mxu1  ;;  %v3078_v1 = vpop.f32.mrb[2].mxu0 }
 0x1f2   : > { %v3141_v2 = vadd.f32 %v3140_v0, %v3139_v61  ;;  %v3142_v3 = vpop.f32.mrb[2].mxu1  ;;  %v3079_v4 = vpop.f32.mrb[3].mxu0 }
 0x1f3   : > { %v3080_v5 = vadd.f32 %v3079_v4, %v3078_v1  ;;  %v3143_v6 = vpop.f32.mrb[3].mxu1 }
 0x1f4   : > { %v4528_v7 = vadd.f32 %v3141_v2, %v3077_v63  ;;  %v3144_v8 = vadd.f32 %v3143_v6, %v3142_v3 }
 0x1f6   : > { %v4530_v9 = vadd.f32 %v3144_v8, %v3080_v5  ;;  %v4031_v5 = vmov 0.0  }
 0x1f7   : > { %v3081_v10 = vpop.f32.mrb[4].mxu0  ;;  %3428 = vmatprep.subr.bf16.mxu0 %v4031_v5  ;;  %3408 = vmatprep.subr.bf16.mxu1 %v4031_v5 }
 0x1f8   : > { %v3145_v11 = vpop.f32.mrb[4].mxu1  ;;  %v3082_v12 = vpop.f32.mrb[5].mxu0  ;;  %3444 = vmatprep.mubr.msk.bf16.mxu0 %vm4032_vm7, %v4031_v5  ;;  %3424 = vmatprep.mubr.msk.bf16.mxu1 %vm4032_vm7, %v4031_v5 }
 0x1f9   : > { %v3083_v13 = vadd.f32 %v3082_v12, %v3081_v10  ;;  %v3146_v14 = vpop.f32.mrb[5].mxu1  ;;  %v3084_v15 = vpop.f32.mrb[6].mxu0 }
 0x1fa   : > { %v3147_v16 = vadd.f32 %v3146_v14, %v3145_v11  ;;  %v3148_v17 = vpop.f32.mrb[6].mxu1  ;;  %v3085_v18 = vpop.f32.mrb[7].mxu0 }
 0x1fb   : > { %v3086_v19 = vadd.f32 %v3085_v18, %v3084_v15  ;;  %v3149_v20 = vpop.f32.mrb[7].mxu1 }
 0x1fc   : > { %v4532_v21 = vadd.f32 %v3147_v16, %v3083_v13  ;;  %v3150_v22 = vadd.f32 %v3149_v20, %v3148_v17 }
 0x1fe   : > { %v4534_v23 = vadd.f32 %v3150_v22, %v3086_v19 }
 0x1ff   : > { %v3087_v24 = vpop.f32.mrb[8].mxu0 }
 0x200   : > { %v3151_v25 = vpop.f32.mrb[8].mxu1  ;;  %v3088_v26 = vpop.f32.mrb[9].mxu0 }
 0x201   : > { %v3089_v27 = vadd.f32 %v3088_v26, %v3087_v24  ;;  %v3152_v28 = vpop.f32.mrb[9].mxu1  ;;  %v3090_v29 = vpop.f32.mrb[10].mxu0 }
 0x202   : > { %v3153_v30 = vadd.f32 %v3152_v28, %v3151_v25  ;;  %v3154_v31 = vpop.f32.mrb[10].mxu1  ;;  %v3091_v32 = vpop.f32.mrb[11].mxu0 }
 0x203   : > { %v3092_v33 = vadd.f32 %v3091_v32, %v3090_v29  ;;  %v3155_v34 = vpop.f32.mrb[11].mxu1 }
 0x204   : > { %v4536_v35 = vadd.f32 %v3153_v30, %v3089_v27  ;;  %v3156_v36 = vadd.f32 %v3155_v34, %v3154_v31 }
 0x206   : > { %v4538_v37 = vadd.f32 %v3156_v36, %v3092_v33 }
 0x207   : > { %v3093_v38 = vpop.f32.mrb[12].mxu0 }
 0x208   : > { %v3157_v39 = vpop.f32.mrb[12].mxu1  ;;  %v3094_v40 = vpop.f32.mrb[13].mxu0 }
 0x209   : > { %v3095_v41 = vadd.f32 %v3094_v40, %v3093_v38  ;;  %v3158_v42 = vpop.f32.mrb[13].mxu1  ;;  %v3096_v43 = vpop.f32.mrb[14].mxu0 }
 0x20a   : > { %v3159_v44 = vadd.f32 %v3158_v42, %v3157_v39  ;;  %v3160_v45 = vpop.f32.mrb[14].mxu1  ;;  %v3097_v46 = vpop.f32.mrb[15].mxu0 }
 0x20b   : > { %v3098_v47 = vadd.f32 %v3097_v46, %v3096_v43  ;;  %v3161_v48 = vpop.f32.mrb[15].mxu1 }
 0x20c   : > { %v4540_v49 = vadd.f32 %v3159_v44, %v3095_v41  ;;  %v3162_v50 = vadd.f32 %v3161_v48, %v3160_v45 }
 0x20e   : > { %v4542_v51 = vadd.f32 %v3162_v50, %v3098_v47 }
 0x20f   : > { %v3099_v52 = vpop.f32.mrb[16].mxu0 }
 0x210   : > { %v3163_v53 = vpop.f32.mrb[16].mxu1  ;;  %v3100_v54 = vpop.f32.mrb[17].mxu0 }
 0x211   : > { %v3101_v55 = vadd.f32 %v3100_v54, %v3099_v52  ;;  %v3164_v56 = vpop.f32.mrb[17].mxu1  ;;  %v3102_v57 = vpop.f32.mrb[18].mxu0 }
 0x212   : > { %v3165_v58 = vadd.f32 %v3164_v56, %v3163_v53  ;;  %v3166_v59 = vpop.f32.mrb[18].mxu1  ;;  %v3103_v60 = vpop.f32.mrb[19].mxu0 }
 0x213   : > { %v3104_v61 = vadd.f32 %v3103_v60, %v3102_v57  ;;  %v3167_v62 = vpop.f32.mrb[19].mxu1 }
 0x214   : > { %v4544_v63 = vadd.f32 %v3165_v58, %v3101_v55  ;;  %v3168_v0 = vadd.f32 %v3167_v62, %v3166_v59 }
 0x216   : > { %v4546_v1 = vadd.f32 %v3168_v0, %v3104_v61 }
 0x217   : > { %v3105_v2 = vpop.f32.mrb[20].mxu0 }
 0x218   : > { %v3169_v3 = vpop.f32.mrb[20].mxu1  ;;  %v3106_v4 = vpop.f32.mrb[21].mxu0 }
 0x219   : > { %v3107_v6 = vadd.f32 %v3106_v4, %v3105_v2  ;;  %v3170_v8 = vpop.f32.mrb[21].mxu1  ;;  %v3108_v10 = vpop.f32.mrb[22].mxu0 }
 0x21a   : > { %v3171_v11 = vadd.f32 %v3170_v8, %v3169_v3  ;;  %v3172_v12 = vpop.f32.mrb[22].mxu1  ;;  %v3109_v13 = vpop.f32.mrb[23].mxu0 }
 0x21b   : > { %v3110_v14 = vadd.f32 %v3109_v13, %v3108_v10  ;;  %v3173_v15 = vpop.f32.mrb[23].mxu1 }
 0x21c   : > { %v4550_v16 = vadd.f32 %v3171_v11, %v3107_v6  ;;  %v3174_v17 = vadd.f32 %v3173_v15, %v3172_v12 }
 0x21e   : > { %v4552_v18 = vadd.f32 %v3174_v17, %v3110_v14 }
 0x21f   : > { %v3111_v19 = vpop.f32.mrb[24].mxu0 }
 0x220   : > { %v3175_v20 = vpop.f32.mrb[24].mxu1  ;;  %v3112_v22 = vpop.f32.mrb[25].mxu0 }
 0x221   : > { %v3113_v24 = vadd.f32 %v3112_v22, %v3111_v19  ;;  %v3176_v25 = vpop.f32.mrb[25].mxu1  ;;  %v3114_v26 = vpop.f32.mrb[26].mxu0 }
 0x222   : > { %v3177_v27 = vadd.f32 %v3176_v25, %v3175_v20  ;;  %v3178_v28 = vpop.f32.mrb[26].mxu1  ;;  %v3115_v29 = vpop.f32.mrb[27].mxu0 }
 0x223   : > { %v3116_v30 = vadd.f32 %v3115_v29, %v3114_v26  ;;  %v3179_v31 = vpop.f32.mrb[27].mxu1 }
 0x224   : > { %v4554_v32 = vadd.f32 %v3177_v27, %v3113_v24  ;;  %v3180_v33 = vadd.f32 %v3179_v31, %v3178_v28 }
 0x226   : > { %v4556_v34 = vadd.f32 %v3180_v33, %v3116_v30 }
 0x227   : > { %v3117_v36 = vpop.f32.mrb[28].mxu0 }
 0x228   : > { %v3181_v38 = vpop.f32.mrb[28].mxu1  ;;  %v3118_v39 = vpop.f32.mrb[29].mxu0 }
 0x229   : > { %v3119_v40 = vadd.f32 %v3118_v39, %v3117_v36  ;;  %v3182_v41 = vpop.f32.mrb[29].mxu1  ;;  %v3120_v42 = vpop.f32.mrb[30].mxu0 }
 0x22a   : > { %v3183_v43 = vadd.f32 %v3182_v41, %v3181_v38  ;;  %v3184_v44 = vpop.f32.mrb[30].mxu1  ;;  %v3121_v45 = vpop.f32.mrb[31].mxu0 }
 0x22b   : > { %v3122_v46 = vadd.f32 %v3121_v45, %v3120_v42  ;;  %v3185_v47 = vpop.f32.mrb[31].mxu1 }
 0x22c   : > { %v4558_v48 = vadd.f32 %v3183_v43, %v3119_v40  ;;  %v3186_v50 = vadd.f32 %v3185_v47, %v3184_v44 }
 0x22e   : > { %v4560_v52 = vadd.f32 %v3186_v50, %v3122_v46 }
 0x22f   : > { %v3203_v53 = vpop.f32.mrb[32].mxu0 }
 0x230   : > { %v3267_v54 = vpop.f32.mrb[32].mxu1  ;;  %v3204_v55 = vpop.f32.mrb[33].mxu0 }
 0x231   : > { %v3205_v56 = vadd.f32 %v3204_v55, %v3203_v53  ;;  %v3268_v57 = vpop.f32.mrb[33].mxu1  ;;  %v3206_v58 = vpop.f32.mrb[34].mxu0 }
 0x232   : > { %v3269_v59 = vadd.f32 %v3268_v57, %v3267_v54  ;;  %v3270_v60 = vpop.f32.mrb[34].mxu1  ;;  %v3207_v61 = vpop.f32.mrb[35].mxu0 }
 0x233   : > { %v1416_v62 = vadd.f32 %v3205_v56, %v4528_v7  ;;  %v3208_v0 = vadd.f32 %v3207_v61, %v3206_v58  ;;  %v3271_v2 = vpop.f32.mrb[35].mxu1 }
 0x234   : > { %v3272_v3 = vadd.f32 %v3271_v2, %v3270_v60 }
 0x235   : > { %v1513_v4 = vadd.f32 %v3269_v59, %v1416_v62  ;;  %v1419_v6 = vadd.f32 %v3208_v0, %v4530_v9 }
 0x237   : > { %v1516_v8 = vadd.f32 %v3272_v3, %v1419_v6  ;;  %v3209_v10 = vpop.f32.mrb[36].mxu0 }
 0x238   : > { %v3273_v11 = vpop.f32.mrb[36].mxu1  ;;  %v3210_v12 = vpop.f32.mrb[37].mxu0 }
 0x239   : > { %v4564_v13 = vadd.f32 %v1516_v8, %v1513_v4  ;;  %v3211_v14 = vadd.f32 %v3210_v12, %v3209_v10  ;;  %v3274_v15 = vpop.f32.mrb[37].mxu1  ;;  %v3212_v17 = vpop.f32.mrb[38].mxu0 }
 0x23a   : > { %v3275_v19 = vadd.f32 %v3274_v15, %v3273_v11  ;;  %v3276_v20 = vpop.f32.mrb[38].mxu1  ;;  %v3213_v22 = vpop.f32.mrb[39].mxu0 }
 0x23b   : > { %v1424_v7 = vadd.f32 %v3211_v14, %v4532_v21  ;;  %v3214_v24 = vadd.f32 %v3213_v22, %v3212_v17  ;;  %v3277_v25 = vpop.f32.mrb[39].mxu1 }
 0x23c   : > { %v3278_v26 = vadd.f32 %v3277_v25, %v3276_v20 }
 0x23d   : > { %v1521_v27 = vadd.f32 %v3275_v19, %v1424_v7  ;;  %v1427_v9 = vadd.f32 %v3214_v24, %v4534_v23 }
 0x23f   : > { %v1524_v28 = vadd.f32 %v3278_v26, %v1427_v9  ;;  %v3215_v29 = vpop.f32.mrb[40].mxu0 }
 0x240   : > { %v3279_v30 = vpop.f32.mrb[40].mxu1  ;;  %v3216_v31 = vpop.f32.mrb[41].mxu0 }
 0x241   : > { %v4568_v33 = vadd.f32 %v1524_v28, %v1521_v27  ;;  %v3217_v36 = vadd.f32 %v3216_v31, %v3215_v29  ;;  %v3280_v38 = vpop.f32.mrb[41].mxu1  ;;  %v3218_v39 = vpop.f32.mrb[42].mxu0 }
 0x242   : > { %v3281_v40 = vadd.f32 %v3280_v38, %v3279_v30  ;;  %v3282_v41 = vpop.f32.mrb[42].mxu1  ;;  %v3219_v42 = vpop.f32.mrb[43].mxu0 }
 0x243   : > { %v1432_v21 = vadd.f32 %v3217_v36, %v4536_v35  ;;  %v3220_v43 = vadd.f32 %v3219_v42, %v3218_v39  ;;  %v3283_v44 = vpop.f32.mrb[43].mxu1  ;;  %v1583_v9 = vrot.slane %v4568_v33, 4 }
 0x244   : > { %v3284_v45 = vadd.f32 %v3283_v44, %v3282_v41 }
 0x245   : > { %v1529_v46 = vadd.f32 %v3281_v40, %v1432_v21  ;;  %v1435_v23 = vadd.f32 %v3220_v43, %v4538_v37 }
 0x247   : > { %v1532_v47 = vadd.f32 %v3284_v45, %v1435_v23  ;;  %v3221_v50 = vpop.f32.mrb[44].mxu0 }
 0x248   : > { %v3285_v53 = vpop.f32.mrb[44].mxu1  ;;  %v3222_v54 = vpop.f32.mrb[45].mxu0 }
 0x249   : > { %v1589_v55 = vadd.f32 %v1532_v47, %v1529_v46  ;;  %v3223_v56 = vadd.f32 %v3222_v54, %v3221_v50  ;;  %v3286_v57 = vpop.f32.mrb[45].mxu1  ;;  %v3224_v58 = vpop.f32.mrb[46].mxu0  ;;  %v1576_v50 = vrot.slane %v4564_v13, 4 }
 0x24a   : > { %v3287_v59 = vadd.f32 %v3286_v57, %v3285_v53  ;;  %v3288_v60 = vpop.f32.mrb[46].mxu1  ;;  %v3225_v61 = vpop.f32.mrb[47].mxu0 }
 0x24b   : > { %v1440_v62 = vadd.f32 %v3223_v56, %v4540_v49  ;;  %v3289_v35 = vpop.f32.mrb[47].mxu1  ;;  %v3226_v0 = vadd.f32 %v3225_v61, %v3224_v58  ;;  %v1590_v39 = vrot.slane %v1589_v55, 4 }
 0x24c   : > { %v3290_v2 = vadd.f32 %v3289_v35, %v3288_v60 }
 0x24d   : > { %v1537_v3 = vadd.f32 %v3287_v59, %v1440_v62  ;;  %v1443_v4 = vadd.f32 %v3226_v0, %v4542_v51  ;;  %v1591_v53 = vadd.f32 %v1590_v39, %v1589_v55 }
 0x24f   : > { %v3227_v37 = vpop.f32.mrb[48].mxu0  ;;  %v1540_v6 = vadd.f32 %v3290_v2, %v1443_v4  ;;  %v1592_v2 = vrot.slane %v1591_v53, 2 }
 0x250   : > { %v3291_v8 = vpop.f32.mrb[48].mxu1  ;;  %v3228_v10 = vpop.f32.mrb[49].mxu0 }
 0x251   : > { %v3229_v11 = vadd.f32 %v3228_v10, %v3227_v37  ;;  %v3292_v12 = vpop.f32.mrb[49].mxu1  ;;  %v3230_v14 = vpop.f32.mrb[50].mxu0  ;;  %v1596_v15 = vadd.f32 %v1540_v6, %v1537_v3 }
 0x252   : > { %v3293_v17 = vadd.f32 %v3292_v12, %v3291_v8  ;;  %v3294_v19 = vpop.f32.mrb[50].mxu1  ;;  %v3231_v20 = vpop.f32.mrb[51].mxu0 }
 0x253   : > { %v1448_v22 = vadd.f32 %v3229_v11, %v4544_v63  ;;  %v3232_v49 = vadd.f32 %v3231_v20, %v3230_v14  ;;  %v3295_v7 = vpop.f32.mrb[51].mxu1  ;;  %v1597_v42 = vrot.slane %v1596_v15, 4  ;;  %v1640_v11 = vlaneseq }
 0x254   : > { %v3296_v24 = vadd.f32 %v3295_v7, %v3294_v19 }
 0x255   : > { %v1545_v25 = vadd.f32 %v3293_v17, %v1448_v22  ;;  %v1451_v26 = vadd.f32 %v3232_v49, %v4546_v1  ;;  %v1584_v1 = vadd.f32 %v1583_v9, %v4568_v33  ;;  %v1598_v54 = vadd.f32 %v1597_v42, %v1596_v15 }
 0x256   : > { %v1577_v33 = vadd.f32 %v1576_v50, %v4564_v13  ;;  %v1593_v13 = vadd.f32 %v1592_v2, %v1591_v53 }
 0x257   : > { %v1548_v51 = vadd.f32 %v3296_v24, %v1451_v26  ;;  %v3233_v27 = vpop.f32.mrb[52].mxu0  ;;  %v1585_v58 = vrot.slane %v1584_v1, 2  ;;  %v1599_v37 = vrot.slane %v1598_v54, 2  ;;  %v4585_v26 = vshrl.u32 %v1640_v11, 7 }
 0x258   : > { %v3297_v28 = vpop.f32.mrb[52].mxu1  ;;  %v3234_v29 = vpop.f32.mrb[53].mxu0  ;;  %v1578_v22 = vrot.slane %v1577_v33, 2 }
 0x259   : > { %v1603_v30 = vadd.f32 %v1548_v51, %v1545_v25  ;;  %v3235_v31 = vadd.f32 %v3234_v29, %v3233_v27  ;;  %v3298_v36 = vpop.f32.mrb[53].mxu1  ;;  %v3236_v38 = vpop.f32.mrb[54].mxu0  ;;  %v1586_v12 = vadd.f32 %v1585_v58, %v1584_v1  ;;  %v1600_v49 = vadd.f32 %v1599_v37, %v1598_v54 }
 0x25a   : > { %v3299_v40 = vadd.f32 %v3298_v36, %v3297_v28  ;;  %v3300_v41 = vpop.f32.mrb[54].mxu1  ;;  %v3237_v63 = vpop.f32.mrb[55].mxu0  ;;  %v1642_v58 = vsub.s32 0, %v4585_v26 }
 0x25b   : > { %v1456_v21 = vadd.f32 %v3235_v31, %v4550_v16  ;;  %v3238_v43 = vadd.f32 %v3237_v63, %v3236_v38  ;;  %v3301_v44 = vpop.f32.mrb[55].mxu1  ;;  %v1604_v45 = vrot.slane %v1603_v30, 4  ;;  %v1579_v38 = vadd.f32 %v1578_v22, %v1577_v33 }
 0x25c   : > { %v3302_v46 = vadd.f32 %v3301_v44, %v3300_v41  ;;  %v1828_v63 = vsub.s32 1, %v4585_v26  ;;  %v1601_v42 = vrot.slane %v1600_v49, 1 }
 0x25d   : > { %v1553_v23 = vadd.f32 %v3299_v40, %v1456_v21  ;;  %v1459_v47 = vadd.f32 %v3238_v43, %v4552_v18  ;;  %v1605_v59 = vadd.f32 %v1604_v45, %v1603_v30 }
 0x25f   : > { %v1556_v56 = vadd.f32 %v3302_v46, %v1459_v47  ;;  %v3239_v57 = vpop.f32.mrb[56].mxu0  ;;  %v1606_v14 = vrot.slane %v1605_v59, 2 }
 0x260   : > { %v3303_v60 = vpop.f32.mrb[56].mxu1  ;;  %v3240_v61 = vpop.f32.mrb[57].mxu0 }
 0x261   : > { %v1610_v16 = vadd.f32 %v1556_v56, %v1553_v23  ;;  %v3241_v62 = vadd.f32 %v3240_v61, %v3239_v57  ;;  %v3304_v35 = vpop.f32.mrb[57].mxu1  ;;  %v3242_v0 = vpop.f32.mrb[58].mxu0  ;;  %v1607_v51 = vadd.f32 %v1606_v14, %v1605_v59  ;;  %v4593_v56 = vld [vmem:[%s4773_s8] sm:$0xff]  ;;  %v1580_v57 = vrot.slane %v1579_v38, 1 }
 0x262   : > { %v3305_v3 = vadd.f32 %v3304_v35, %v3303_v60  ;;  %v3306_v4 = vpop.f32.mrb[58].mxu1  ;;  %v3243_v18 = vpop.f32.mrb[59].mxu0 }
 0x263   : > { %v1611_v6 = vrot.slane %v1610_v16, 4  ;;  %v1464_v55 = vadd.f32 %v3241_v62, %v4554_v32  ;;  %v3244_v8 = vadd.f32 %v3243_v18, %v3242_v0  ;;  %v3307_v10 = vpop.f32.mrb[59].mxu1  ;;  %v1587_v32 = vrot.slane %v1586_v12, 1 }
 0x264   : > { %v3308_v15 = vadd.f32 %v3307_v10, %v3306_v4  ;;  %v1608_v46 = vrot.slane %v1607_v51, 1  ;;  %v1829_v62 = vrot.slane %v4593_v56, %v1828_v63 }
 0x265   : > { %v1612_v17 = vadd.f32 %v1611_v6, %v1610_v16  ;;  %v1561_v19 = vadd.f32 %v3305_v3, %v1464_v55  ;;  %v1467_v20 = vadd.f32 %v3244_v8, %v4556_v34  ;;  %v1594_v34 = vrot.slane %v1593_v13, 1 }
 0x266   : > { %v1588_v45 = vadd.f32 %v1587_v32, %v1586_v12  ;;  %v1609_v0 = vadd.f32 %v1608_v46, %v1607_v51  ;;  %v1581_v55 = vadd.f32 %v1580_v57, %v1579_v38  ;;  %v1643_v8 = vrot.slane %v4593_v56, %v1642_v58 }
 0x267   : > { %v1613_v7 = vrot.slane %v1612_v17, 2  ;;  %v1564_v24 = vadd.f32 %v3308_v15, %v1467_v20  ;;  %v3245_v25 = vpop.f32.mrb[60].mxu0  ;;  %v1595_v59 = vadd.f32 %v1594_v34, %v1593_v13 }
 0x268   : > { %v3309_v27 = vpop.f32.mrb[60].mxu1  ;;  %v3246_v9 = vpop.f32.mrb[61].mxu0  ;;  %v1633_v35 = vmul.f32 0.0625, %v1588_v45 }
 0x269   : > { %v1614_v28 = vadd.f32 %v1613_v7, %v1612_v17  ;;  %v1617_v29 = vadd.f32 %v1564_v24, %v1561_v19  ;;  %v3247_v30 = vadd.f32 %v3246_v9, %v3245_v25  ;;  %v3310_v31 = vpop.f32.mrb[61].mxu1  ;;  %v3248_v36 = vpop.f32.mrb[62].mxu0  ;;  %v1634_v10 = vmul.f32 0.0625, %v1595_v59 }
 0x26a   : > { %v3311_v39 = vadd.f32 %v3310_v31, %v3309_v27  ;;  %v3312_v40 = vpop.f32.mrb[62].mxu1  ;;  %v3249_v41 = vpop.f32.mrb[63].mxu0  ;;  %v1636_v7 = vmul.f32 0.0625, %v1609_v0  ;;  %v1632_v9 = vmul.f32 0.0625, %v1581_v55 }
 0x26b   : > { %v1618_v21 = vrot.slane %v1617_v29, 4  ;;  %v1472_v43 = vadd.f32 %v3247_v30, %v4558_v48  ;;  %v3250_v44 = vadd.f32 %v3249_v41, %v3248_v36  ;;  %v3313_v1 = vpop.f32.mrb[63].mxu1  ;;  %v1615_v47 = vrot.slane %v1614_v28, 1 }
 0x26c   : > { %v3314_v23 = vadd.f32 %v3313_v1, %v3312_v40  ;;  %v1602_v48 = vadd.f32 %v1601_v42, %v1600_v49  ;;  %v4602_v49 = vadd.f32 %v1643_v8, %v1633_v35  ;;  %v4604_v27 = vadd.f32 %v1643_v8, %v1634_v10  ;;  %v3693_v10 = vld [vmem:[#allocation10] sm:$0xff]  }
 0x26d   : > { %v1619_v50 = vadd.f32 %v1618_v21, %v1617_v29  ;;  %v1569_v53 = vadd.f32 %v3311_v39, %v1472_v43  ;;  %v1475_v54 = vadd.f32 %v3250_v44, %v4560_v52  ;;  %v1616_v2 = vadd.f32 %v1615_v47, %v1614_v28  ;;  %3429 = vmatpush3.bf16.msra.mxu0 %v3693_v10 }
 0x26e   : > { %v1635_v17 = vmul.f32 0.0625, %v1602_v48  ;;  %v4608_v31 = vadd.f32 %v1643_v8, %v1636_v7  ;;  %v1653_v36 = vmul.f32 %v4602_v49, %v4602_v49  ;;  %v1654_v39 = vmul.f32 %v4604_v27, %v4604_v27  ;;  %3430 = vmatprep.subr.bf16.mxu0 %v4031_v5  ;;  %v3702_v7 = vld [vmem:[#allocation11 + $0x20] sm:$0xff]  }
 0x26f   : > { %v1620_v60 = vrot.slane %v1619_v50, 2  ;;  %v1572_v61 = vadd.f32 %v3314_v23, %v1475_v54  ;;  %v3331_v16 = vpop.f32.mrb[64].mxu0  ;;  %v1637_v24 = vmul.f32 0.0625, %v1616_v2  ;;  %v4618_v41 = vadd.f32 %v1643_v8, %v1632_v9  ;;  %v3707_v9 = vld [vmem:[#allocation10 + $0x38] sm:$0xff]  }
 0x270   : > { %v3332_v52 = vpop.f32.mrb[65].mxu0  ;;  %v3353_v33 = vpop.f32.mrb[64].mxu1  ;;  %v4606_v28 = vadd.f32 %v1643_v8, %v1635_v17  ;;  %v1656_v43 = vmul.f32 %v4608_v31, %v4608_v31  ;;  %v1668_v44 = vrot.slane %v1653_v36, 7  ;;  %v1671_v23 = vrot.slane %v1654_v39, 6  ;;  %v3697_v17 = vld [vmem:[#allocation10 + $0x10] sm:$0xff]  }
 0x271   : > { %v1621_v3 = vadd.f32 %v1620_v60, %v1619_v50  ;;  %v1624_v4 = vadd.f32 %v1572_v61, %v1569_v53  ;;  %v3333_v18 = vadd.f32 %v3332_v52, %v3331_v16  ;;  %v3334_v37 = vpop.f32.mrb[66].mxu0  ;;  %v3354_v6 = vpop.f32.mrb[65].mxu1  ;;  %v4612_v34 = vadd.f32 %v1643_v8, %v1637_v24  ;;  %v3703_v24 = vld [vmem:[#allocation10 + $0x28] sm:$0xff]  }
 0x272   : > { %v3335_v12 = vpop.f32.mrb[67].mxu0  ;;  %v3355_v14 = vadd.f32 %v3354_v6, %v3353_v33  ;;  %v3356_v15 = vpop.f32.mrb[66].mxu1  ;;  %v1655_v21 = vmul.f32 %v4606_v28, %v4606_v28  ;;  %v1652_v47 = vmul.f32 %v4618_v41, %v4618_v41  ;;  %v1677_v54 = vrot.slane %v1656_v43, 4 }
 0x273   : > { %v1622_v19 = vrot.slane %v1621_v3, 1  ;;  %v1625_v20 = vrot.slane %v1624_v4, 4  ;;  %v2153_v22 = vadd.f32 %v3333_v18, %v1829_v62  ;;  %v3357_v13 = vpop.f32.mrb[67].mxu1  ;;  %v1657_v45 = vmul.f32 %v4612_v34, %v4612_v34  ;;  %v3694_v12 = vld [vmem:[#allocation11] sm:$0xff]   ;;  %v3696_v15 = vld [vmem:[#allocation11 + $0x8] sm:$0xff]  }
 0x274   : > { %v1674_v53 = vrot.slane %v1655_v21, 5  ;;  %v1670_v59 = vsel %vm1669_vm0, %v1668_v44, %v1652_v47  ;;  %3409 = vmatpush3.bf16.msra.mxu1 %v3694_v12  ;;  %v3701_v13 = vld [vmem:[#allocation10 + $0x20] sm:$0xff]  }
 0x275   : > { %v1623_v25 = vadd.f32 %v1622_v19, %v1621_v3  ;;  %v1626_v32 = vadd.f32 %v1625_v20, %v1624_v4  ;;  %v2193_v51 = vadd.f32 %v3355_v14, %v2153_v22  ;;  %v1680_v48 = vrot.slane %v1657_v45, 3  ;;  %v3695_v14 = vld [vmem:[#allocation10 + $0x8] sm:$0xff]   ;;  %3410 = vmatprep.subr.bf16.mxu1 %v4031_v5  ;;  %v3698_v19 = vld [vmem:[#allocation11 + $0x10] sm:$0xff]   ;;  %v3699_v20 = vld [vmem:[#allocation10 + $0x18] sm:$0xff]  }
 0x276   : > { %v1673_v60 = vsel %vm1672_vm1, %v1671_v23, %v1670_v59  ;;  %3431 = vmatpush3.bf16.msra.mxu0 %v3695_v14  ;;  %v3700_v22 = vld [vmem:[#allocation11 + $0x18] sm:$0xff]  }
 0x277   : > { %v1627_v29 = vrot.slane %v1626_v32, 2  ;;  %v1638_v30 = vmul.f32 0.0625, %v1623_v25  ;;  %v1676_v62 = vsel %vm1675_vm2, %v1674_v53, %v1673_v60  ;;  %3432 = vmatprep.subr.bf16.mxu0 %v4031_v5  ;;  %v3704_v25 = vld [vmem:[#allocation11 + $0x28] sm:$0xff]  }
 0x278   : > { %v1679_v35 = vsel %vm1678_vm3, %v1677_v54, %v1676_v62  ;;  %3411 = vmatpush3.bf16.msra.mxu1 %v3696_v15 }
 0x279   : > { %v1628_v38 = vadd.f32 %v1627_v29, %v1626_v32  ;;  %v4616_v40 = vadd.f32 %v1643_v8, %v1638_v30  ;;  %v1682_v0 = vsel %vm1681_vm4, %v1680_v48, %v1679_v35  ;;  %3412 = vmatprep.subr.bf16.mxu1 %v4031_v5  ;;  %v3705_v32 = vld [vmem:[#allocation10 + $0x30] sm:$0xff]   ;;  %v3708_v29 = vld [vmem:[#allocation11 + $0x38] sm:$0xff]  }
 0x27a   : > { %3433 = vmatpush3.bf16.msra.mxu0 %v3697_v17 }
 0x27b   : > { %v1629_v42 = vrot.slane %v1628_v38, 1  ;;  %v1658_v46 = vmul.f32 %v4616_v40, %v4616_v40  ;;  %3434 = vmatprep.subr.bf16.mxu0 %v4031_v5 }
 0x27c   : > { %3413 = vmatpush3.bf16.msra.mxu1 %v3698_v19 }
 0x27d   : > { %v1630_v1 = vadd.f32 %v1629_v42, %v1628_v38  ;;  %v1683_v61 = vrot.slane %v1658_v46, 2  ;;  %3414 = vmatprep.subr.bf16.mxu1 %v4031_v5 }
 0x27e   : > { %3435 = vmatpush3.bf16.msra.mxu0 %v3699_v20 }
 0x27f   : > { %v1639_v50 = vmul.f32 0.0625, %v1630_v1  ;;  %v1685_v33 = vsel %vm1684_vm5, %v1683_v61, %v1682_v0  ;;  %3436 = vmatprep.subr.bf16.mxu0 %v4031_v5 }
 0x280   : > { %3415 = vmatpush3.bf16.msra.mxu1 %v3700_v22 }
 0x281   : > { %v4630_v57 = vadd.f32 %v1643_v8, %v1639_v50  ;;  %3416 = vmatprep.subr.bf16.mxu1 %v4031_v5 }
 0x282   : > { %3437 = vmatpush3.bf16.msra.mxu0 %v3701_v13 }
 0x283   : > { %v1659_v16 = vmul.f32 %v4630_v57, %v4630_v57  ;;  %3438 = vmatprep.subr.bf16.mxu0 %v4031_v5 }
 0x284   : > { %3417 = vmatpush3.bf16.msra.mxu1 %v3702_v7 }
 0x285   : > { %v1686_v52 = vrot.slane %v1659_v16, 1  ;;  %3418 = vmatprep.subr.bf16.mxu1 %v4031_v5 }
 0x286   : > { %3439 = vmatpush3.bf16.msra.mxu0 %v3703_v24 }
 0x287   : > { %v1688_v2 = vsel %vm1687_vm6, %v1686_v52, %v1685_v33  ;;  %3440 = vmatprep.subr.bf16.mxu0 %v4031_v5 }
 0x288   : > { %1690 = vadd.xlane.f32.xlu0 %v1688_v2  ;;  %3419 = vmatpush3.bf16.msra.mxu1 %v3704_v25 }
 0x289   : > { %3420 = vmatprep.subr.bf16.mxu1 %v4031_v5 }
 0x28a   : > { %3441 = vmatpush3.bf16.msra.mxu0 %v3705_v32 }
 0x28b   : > { %3442 = vmatprep.subr.bf16.mxu0 %v4031_v5 }
 0x28e   : > { %3443 = vmatpush3.bf16.msra.mxu0 %v3707_v9 }
 0x28f   : > { %v3375_v3 = vpop.f32.mrb[68].mxu0 }
 0x290   : > { %v3376_v4 = vpop.f32.mrb[69].mxu0 }
 0x291   : > { %v3377_v18 = vadd.f32 %v3376_v4, %v3375_v3  ;;  %v3378_v37 = vpop.f32.mrb[70].mxu0 }
 0x292   : > { %v3379_v6 = vpop.f32.mrb[71].mxu0 }
 0x293   : > { %v4641_v55 = vadd.f32 %v3377_v18, %v2193_v51  ;;  %v3706_v51 = vld [vmem:[#allocation11 + $0x30] sm:$0xff]  }
 0x294   : > { %3421 = vmatpush3.bf16.msra.mxu1 %v3706_v51  ;;  %v2495_v51 = vsub.s32 2, %v4585_v26 }
 0x295   : > { %v2238_v8 = vmul.f32 %v4641_v55, %v4641_v55  ;;  %3422 = vmatprep.subr.bf16.mxu1 %v4031_v5 }
 0x296   : > { %v2496_v9 = vrot.slane %v4593_v56, %v2495_v51 }
 0x297   : > { %2239 = vadd.xlane.f32.xlu0 %v2238_v8 }
 0x298   : > { %3423 = vmatpush3.bf16.msra.mxu1 %v3708_v29 }
 0x299   : > { %3448 = vmatprep.subr.bf16.mxu1 %v4031_v5 }
 0x315   : > { %v1691_v30 = vpop.xlane.xlu0 %1690 }
 0x316   : > { %v1692_v36 = vmax.f32 %v1691_v30, 1e-24 }
 0x318   : > { %3717 = vrsqrt.f32 %v1692_v36 }
 0x322   : > { %v3718_v38 = vpop.eup %3717 }
 0x323   : > { %v1695_v39 = vrot.slane %v3718_v38, 1  ;;  %v1696_v42 = vrot.slane %v3718_v38, 2  ;;  %v1697_v21 = vrot.slane %v3718_v38, 3  ;;  %v1698_v43 = vrot.slane %v3718_v38, 4 }
 0x324   : > { %v2240_v44 = vpop.xlane.xlu0 %2239  ;;  %v1699_v1 = vrot.slane %v3718_v38, 5  ;;  %v1700_v45 = vrot.slane %v3718_v38, 6  ;;  %v1701_v46 = vrot.slane %v3718_v38, 7  ;;  %v1710_v23 = vmul.f32 %v3718_v38, %v4618_v41 }
 0x325   : > { %v2241_v47 = vmax.f32 %v2240_v44, 1e-24  ;;  %v1711_v50 = vmul.f32 %v1695_v39, %v4602_v49  ;;  %v1712_v53 = vmul.f32 %v1696_v42, %v4604_v27  ;;  %v1713_v54 = vmul.f32 %v1697_v21, %v4606_v28 }
 0x326   : > { %v1714_v59 = vmul.f32 %v1698_v43, %v4608_v31  ;;  %v1715_v48 = vmul.f32 %v1699_v1, %v4612_v34  ;;  %v1716_v60 = vmul.f32 %v1700_v45, %v4616_v40  ;;  %v1717_v61 = vmul.f32 %v1701_v46, %v4630_v57 }
 0x327   : > { %3719 = vrsqrt.f32 %v2241_v47  ;;  %v2261_v16 = vpack.c.bf16 %v1710_v23, %v1710_v23  ;;  %v2262_v62 = vpack.c.bf16 %v1711_v50, %v1711_v50  ;;  %v2263_v35 = vpack.c.bf16 %v1712_v53, %v1712_v53  ;;  %v3709_v47 = vld [vmem:[#allocation13] sm:$0xff]   ;;  %v3710_v50 = vld [vmem:[#allocation13 + $0x8] sm:$0xff]   ;;  %v3711_v53 = vld [vmem:[#allocation13 + $0x10] sm:$0xff]  }
 0x328   : > { %v2264_v41 = vpack.c.bf16 %v1713_v54, %v1713_v54  ;;  %v2265_v0 = vpack.c.bf16 %v1714_v59, %v1714_v59  ;;  %v2266_v52 = vpack.c.bf16 %v1715_v48, %v1715_v48  ;;  %v2267_v49 = vpack.c.bf16 %v1716_v60, %v1716_v60  ;;  %v3712_v54 = vld [vmem:[#allocation13 + $0x18] sm:$0xff]   ;;  %v3713_v59 = vld [vmem:[#allocation13 + $0x20] sm:$0xff]   ;;  %v3714_v48 = vld [vmem:[#allocation13 + $0x28] sm:$0xff]  }
 0x329   : > { %v2268_v33 = vpack.c.bf16 %v1717_v61, %v1717_v61  ;;  %v2294_v27 = vunpack.c.l.b16 %v2262_v62  ;;  %v2295_v2 = vunpack.c.l.b16 %v2263_v35  ;;  %v2293_v31 = vunpack.c.l.b16 %v2261_v16  ;;  %v3715_v60 = vld [vmem:[#allocation13 + $0x30] sm:$0xff]   ;;  %v3716_v61 = vld [vmem:[#allocation13 + $0x38] sm:$0xff]  }
 0x32a   : > { %v2296_v28 = vunpack.c.l.b16 %v2264_v41  ;;  %v2297_v3 = vunpack.c.l.b16 %v2265_v0  ;;  %v2298_v4 = vunpack.c.l.b16 %v2266_v52  ;;  %v2299_v40 = vunpack.c.l.b16 %v2267_v49 }
 0x32b   : > { %v2301_v34 = vrot.slane %v2294_v27, 7  ;;  %v2303_v18 = vrot.slane %v2295_v2, 6  ;;  %v2300_v37 = vunpack.c.l.b16 %v2268_v33  ;;  %v2512_v41 = vsub.s32 3, %v4585_v26 }
 0x32c   : > { %v2305_v6 = vrot.slane %v2296_v28, 5  ;;  %v2307_v10 = vrot.slane %v2297_v3, 4  ;;  %v2309_v14 = vrot.slane %v2298_v4, 3  ;;  %v2311_v17 = vrot.slane %v2299_v40, 2 }
 0x32d   : > { %v2302_v57 = vsel %vm1669_vm0, %v2301_v34, %v2293_v31  ;;  %v2313_v22 = vrot.slane %v2300_v37, 1  ;;  %v2517_v0 = vsub.s32 4, %v4585_v26  ;;  %v2513_v52 = vrot.slane %v4593_v56, %v2512_v41 }
 0x32e   : > { %v2304_v8 = vsel %vm1672_vm1, %v2303_v18, %v2302_v57  ;;  %v2544_v37 = vsub.s32 5, %v4585_v26 }
 0x32f   : > { %v2306_v12 = vsel %vm1675_vm2, %v2305_v6, %v2304_v8  ;;  %v2518_v27 = vrot.slane %v4593_v56, %v2517_v0 }
 0x330   : > { %v2308_v15 = vsel %vm1678_vm3, %v2307_v10, %v2306_v12  ;;  %v2545_v57 = vrot.slane %v4593_v56, %v2544_v37 }
 0x331   : > { %v3720_v19 = vpop.eup %3719  ;;  %v2310_v20 = vsel %vm1681_vm4, %v2309_v14, %v2308_v15 }
 0x332   : > { %v2243_v13 = vmul.f32 %v3720_v19, %v4641_v55  ;;  %v2312_v7 = vsel %vm1684_vm5, %v2311_v17, %v2310_v20 }
 0x333   : > { %v2314_v24 = vsel %vm1687_vm6, %v2313_v22, %v2312_v7 }
 0x334   : > { %v2244_v25 = vpack.c.bf16 %v2243_v13, %v2243_v13  ;;  %v2315_v32 = vpack.c.b16 %v2314_v24, %v2314_v24  ;;  %v2647_v24 = vsub.s32 6, %v4585_v26 }
 0x336   : > { %3445 = vmatmul.mubr.bf16.vlgmr.msra.gmra.mrb[72].mxu0 %v2244_v25  ;;  %3425 = vmatmul.mubr.bf16.vlgmr.msra.gmra.mrb[68].mxu1 %v2315_v32  ;;  %v2652_v25 = vsub.s32 7, %v4585_v26  ;;  %v2648_v32 = vrot.slane %v4593_v56, %v2647_v24 }
 0x337   : > { %3464 = vmatprep.mubr.msk.bf16.mxu1 %vm4032_vm7, %v4031_v5  ;;  %3449 = vmatpush3.bf16.msra.mxu1 %v3709_v47 }
 0x338   : > { %3450 = vmatprep.subr.bf16.mxu1 %v4031_v5 }
 0x33b   : > { %3451 = vmatpush3.bf16.msra.mxu1 %v3710_v50 }
 0x33c   : > { %3452 = vmatprep.subr.bf16.mxu1 %v4031_v5 }
 0x33f   : > { %3453 = vmatpush3.bf16.msra.mxu1 %v3711_v53 }
 0x340   : > { %3454 = vmatprep.subr.bf16.mxu1 %v4031_v5 }
 0x343   : > { %3455 = vmatpush3.bf16.msra.mxu1 %v3712_v54 }
 0x344   : > { %3456 = vmatprep.subr.bf16.mxu1 %v4031_v5 }
 0x347   : > { %3457 = vmatpush3.bf16.msra.mxu1 %v3713_v59 }
 0x348   : > { %3458 = vmatprep.subr.bf16.mxu1 %v4031_v5 }
 0x34b   : > { %3459 = vmatpush3.bf16.msra.mxu1 %v3714_v48 }
 0x34c   : > { %3460 = vmatprep.subr.bf16.mxu1 %v4031_v5 }
 0x34f   : > { %3461 = vmatpush3.bf16.msra.mxu1 %v3715_v60 }
 0x350   : > { %3462 = vmatprep.subr.bf16.mxu1 %v4031_v5 }
 0x353   : > { %3463 = vmatpush3.bf16.msra.mxu1 %v3716_v61 }
 0x409   : > { %v2487_v29 = vpop.f32.mrb[72].mxu0  ;;  %v2399_v30 = vpop.f32.mrb[68].mxu1 }
 0x40a   : > { %v2488_v36 = vadd.f32 %v2487_v29, %v2399_v30  ;;  %v3446_v38 = vpop.f32.mrb[73].mxu0  ;;  %v3426_v55 = vpop.f32.mrb[69].mxu1  ;;  %v2653_v29 = vrot.slane %v4593_v56, %v2652_v25  ;;  %v4033_v56 = vmov 0  }
 0x40b   : > { %v2490_v39 = vpop.f32.mrb[74].mxu0  ;;  %v2402_v42 = vpop.f32.mrb[70].mxu1  ;;  %v482_v55 = vld [vmem:[%s4773_s8 + $0x8] sm:$0xff]  ;;  %3579 = vset.pattern.permute.xlu1 %v4033_v56  ;;  %3580 = vset.pattern.permute.xlu0 %v4033_v56 }
 0x40c   : > { %v3447_v21 = vpop.f32.mrb[75].mxu0  ;;  %v3427_v43 = vpop.f32.mrb[71].mxu1  ;;  %v2497_v44 = vadd.f32 %v2496_v9, %v2488_v36 }
 0x40d   : > { %v2663_v43 = vrot.slane %v482_v55, %v1642_v58 }
 0x40e   : > { %2498 = vadd.xlane.f32.xlu1 %v2497_v44 }
 0x49b   : > { %v2499_v1 = vpop.xlane.xlu1 %2498 }
 0x49c   : > { %v2501_v45 = vmul.f32 0.0078125, %v2499_v1 }
 0x49e   : > { %v2502_v46 = vsub.f32 %v2497_v44, %v2501_v45  ;;  %v2670_v45 = vrot.slane %v482_v55, %v1828_v63  ;;  %v2672_v63 = vld [vmem:[%s479_s5] sm:$0xff] }
 0x4a0   : > { %v2503_v23 = vmul.f32 %v2502_v46, %v2502_v46 }
 0x4a2   : > { %2504 = vadd.xlane.f32.xlu1 %v2503_v23 }
 0x52f   : > { %v2505_v16 = vpop.xlane.xlu1 %2504 }
 0x530   : > { %v2506_v62 = vmul.f32 0.0078125, %v2505_v16 }
 0x532   : > { %v2507_v35 = vadd.f32 1e-05, %v2506_v62 }
 0x534   : > { %3721 = vrsqrt.f32 %v2507_v35 }
 0x53e   : > { %v3722_v49 = vpop.eup %3721 }
 0x53f   : > { %v2509_v33 = vmul.f32 %v3722_v49, %v2502_v46 }
 0x541   : > { %v2514_v2 = vmul.f32 %v2513_v52, %v2509_v33 }
 0x543   : > { %v2519_v28 = vadd.f32 %v2518_v27, %v2514_v2 }
 0x545   : > { %v2521_v3 = vmul.f32 0.70710677, %v2519_v28  ;;  %v2520_v4 = vmul.f32 0.5, %v2519_v28 }
 0x547   : > { %3723 = verf.f32 %v2521_v3 }
 0x551   : > { %v3724_v31 = vpop.eup %3723 }
 0x552   : > { %v2523_v34 = vadd.f32 1.0, %v3724_v31  ;;  %v2703_v31 = vand.u32 127, %v1640_v11 }
 0x554   : > { %v2524_v18 = vmul.f32 %v2523_v34, %v2520_v4  ;;  %vm2704_vm11 = vcmp.eq.s32.totalorder %v2703_v31, 0  ;;  %vm2711_vm12 = vcmp.eq.s32.totalorder %v2703_v31, 1  ;;  %vm2718_vm13 = vcmp.eq.s32.totalorder %v2703_v31, 2 }
 0x556   : > { %v2525_v40 = vpack.c.bf16 %v2524_v18, %v2524_v18 }
 0x558   : > { %3465 = vmatmul.mubr.bf16.vlgmr.msra.gmra.mrb[72].mxu1 %v2525_v40 }
 0x62b   : > { %v2628_v6 = vpop.f32.mrb[72].mxu1 }
 0x62c   : > { %v2629_v8 = vadd.f32 %v2628_v6, %v2545_v57  ;;  %v3466_v10 = vpop.f32.mrb[73].mxu1 }
 0x62d   : > { %v2631_v12 = vpop.f32.mrb[74].mxu1 }
 0x62e   : > { %2634 = vadd.xlane.f32.xlu0 %v2629_v8  ;;  %v3467_v14 = vpop.f32.mrb[75].mxu1 }
 0x6bb   : > { %v2635_v15 = vpop.xlane.xlu0 %2634 }
 0x6bc   : > { %v2636_v17 = vmul.f32 0.0078125, %v2635_v15 }
 0x6be   : > { %v2637_v19 = vsub.f32 %v2629_v8, %v2636_v17 }
 0x6c0   : > { %v2638_v20 = vmul.f32 %v2637_v19, %v2637_v19 }
 0x6c2   : > { %2639 = vadd.xlane.f32.xlu1 %v2638_v20 }
 0x74f   : > { %v2640_v22 = vpop.xlane.xlu1 %2639 }
 0x750   : > { %v2641_v13 = vmul.f32 0.0078125, %v2640_v22 }
 0x752   : > { %v2642_v7 = vadd.f32 1e-05, %v2641_v13 }
 0x754   : > { %3725 = vrsqrt.f32 %v2642_v7 }
 0x75e   : > { %v3726_v51 = vpop.eup %3725 }
 0x75f   : > { %v2644_v9 = vmul.f32 %v3726_v51, %v2637_v19 }
 0x761   : > { %v2649_v30 = vmul.f32 %v2648_v32, %v2644_v9 }
 0x763   : > { %v2654_v36 = vadd.f32 %v2653_v29, %v2649_v30 }
 0x765   : > { %v2656_v38 = vmul.f32 0.70710677, %v2654_v36  ;;  %v2655_v42 = vmul.f32 0.5, %v2654_v36 }
 0x767   : > { %3727 = verf.f32 %v2656_v38 }
 0x771   : > { %v3728_v39 = vpop.eup %3727 }
 0x772   : > { %v2658_v21 = vadd.f32 1.0, %v3728_v39 }
 0x774   : > { %v2659_v44 = vmul.f32 %v2658_v21, %v2655_v42 }
 0x776   : > { %v2664_v1 = vmul.f32 %v2663_v43, %v2659_v44 }
 0x778   : > { %2665 = vadd.xlane.f32.xlu0 %v2664_v1 }
 0x805   : > { %v2666_v46 = vpop.xlane.xlu0 %2665 }
 0x806   : > { %v2671_v23 = vadd.f32 %v2670_v45, %v2666_v46 }
 0x808   : > { %v2676_v47 = vand.u32 2147483647, %v2671_v23  ;;  %v3050_v50 = vmul.f32 -1.442695, %v2671_v23  ;;  %v2674_v35 = vmul.f32 %v2672_v63, %v2671_v23  ;;  %v2673_v41 = vmax.f32 %v2671_v23, 0.0 }
 0x80a   : > { %v2677_v53 = vsub.f32 0.0, %v2676_v47  ;;  %3729 = vpow2.f32 %v3050_v50  ;;  %v2675_v2 = vsub.f32 %v2673_v41, %v2674_v35 }
 0x80c   : > { %v2678_v54 = vmul.f32 1.442695, %v2677_v53 }
 0x80e   : > { %3731 = vpow2.f32 %v2678_v54 }
 0x814   : > { %v3730_v58 = vpop.eup %3729 }
 0x815   : > { %v2693_v59 = vadd.f32 1.0, %v3730_v58 }
 0x817   : > { %3733 = vrcp.f32 %v2693_v59 }
 0x818   : > { %v3732_v48 = vpop.eup %3731 }
 0x819   : > { %v2680_v60 = vadd.f32 1.0, %v3732_v48  ;;  %v2683_v26 = vmul.f32 -0.5, %v3732_v48  ;;  %v2686_v0 = vand.u32 2147483647, %v3732_v48 }
 0x81b   : > { %3735 = vlog2.f32 %v2680_v60  ;;  %v2684_v16 = vadd.f32 1.0, %v2683_v26  ;;  %vm2687_vm10 = vcmp.lt.f32.partialorder %v2686_v0, 0.0004427343 }
 0x81d   : > { %v2685_v27 = vmul.f32 %v3732_v48, %v2684_v16 }
 0x821   : > { %v3734_v61 = vpop.eup %3733 }
 0x822   : > { %2707 = vperm.xlu1 %3579, %v3734_v61   ;;  %vm2696_vm8 = vcmp.ge.f32.partialorder %v3734_v61, 0.5 }
 0x823   : > { %v3051_v62 = vsel %vm2696_vm8, 1.0, %v4031_v5 }
 0x824   : > { %vm2699_vm9 = vcmp.eq.f32.partialorder %v3051_v62, %v2672_v63 }
 0x825   : > { %v3736_v52 = vpop.eup %3735  ;;  %v3052_v49 = vsel %vm2699_vm9, 1.0, %v4031_v5 }
 0x826   : > { %2721 = vperm.xlu1 %3579, %v3052_v49   ;;  %v2682_v33 = vmul.f32 0.6931472, %v3736_v52 }
 0x828   : > { %v2688_v28 = vsel %vm2687_vm10, %v2685_v27, %v2682_v33 }
 0x829   : > { %v2689_v3 = vadd.f32 %v2688_v28, %v2675_v2 }
 0x82b   : > { %2714 = vperm.xlu0 %3580, %v2689_v3  }
 0x8a1   : > { %v2708_v4 = vpop.permute.xlu1 %2707 }
 0x8a2   : > { %v2710_v5 = vsel %vm2704_vm11, %v2708_v4, 0.0 }
 0x8a5   : > { %v2722_v18 = vpop.permute.xlu1 %2721 }
 0x8aa   : > { %v2715_v34 = vpop.permute.xlu0 %2714 }
 0x8ab   : > { %v2717_v40 = vsel %vm2711_vm12, %v2715_v34, %v2710_v5 }
 0x8ac   : > { %v2724_v11 = vsel %vm2718_vm13, %v2722_v18, %v2717_v40 }
 0x8ad   : > { %2725 = vst [vmem:[%s474_s28] sm:$0xff] %v2724_v11 }
 0x8ae   : > { %3950 = shalt.err (!%p3947_p11)
}
 0x8af   : > { %s3951_s7 = scalar_lea.hbm %s4721_s16, 128  ;;  %s3955_s9 = scalar_lea.hbm %s4812_s6, 256 }
 0x8b0   : > { %p3952_p8 = scmp.ne.s32.totalorder %s4721_s16, %s3951_s7  ;;  %p3956_p1 = scmp.lt.u32.totalorder %s4721_s16, %s4812_s6 }
 0x8b1   : > { %p3957_p13 = scmp.lt.u32.totalorder %s3955_s9, %s3951_s7  ;;  %p3959_p2 = scmp.lt.u32.totalorder %s3951_s7, %s4721_s16 }
 0x8b2   : > { %p3953_p4 = pnand %p3952_p8, %p4813_p6 }
 0x8b3   : > { %p3958_p0 = por %p3957_p13, %p3956_p1 }
 0x8b4   : > { %p3954_p12 = pneg %p3953_p4 }
 0x8b5   : > { %p3960_p10 = por %p3959_p2, %p3958_p0 }
 0x8b7   : > { %p3961_p5 = pnand %p3960_p10, %p3954_p12 }
 0x8b9   : > { %3964 = shalt.err (!%p3961_p5)
}
 0x8ba   : > { %3495 = dma.vmem_to_hbm [thread:$0]  (%p4813_p6), %s4723_s29, 128, %s4721_s16, %s2727_s15  }
 0x8bb PF: > { %s2752_s5 = sand.u32 1, %s4007_s30   ;;  %p4814_p9 = scmp.ne.s32.totalorder %s4799_s26, 0 }
 0x8bc   : > { %p4815_p3 = scmp.ge.s32.totalorder %s4019_s12, 2  ;;  %s2753_s13 = scalar_lea.sflag [#allocation4], %s2752_s5 }
 0x8be   : > { %p3521_p7 = pnand %p4815_p3, %p4814_p9 }
 0x8c0   : > { %4002 = dma.done.wait (!%p3521_p7), %s2753_s13, 128  }
 0x8c1   : > { %4004 = vsyncadd (!%p3521_p7), %s2753_s13, 4294967168  ;;  %p27_p11 = scmp.ge.s32.totalorder %s4258_s27, 4   ;;  %s4816_s30 = smov %s4011_s10 }
 0x8c2   : > { %s4817_s10 = smov %s4015_s11  ;;  %s4818_s11 = smov %s4270_s22 }
 0x8c3   : > { %s4819_s12 = smov %s4258_s27  ;;  %29 = sbr.rel (!%p27_p11) target bundleno = 17 (0x11), region = 137 }
 0x8ca   :  { %2758 = vsyncpa [#allocation3], 1 }
 0x8cb   :  { %2760 = vsyncpa [#allocation3 + $0x1], 1 }
 0x8cc   :  { %2761 = vsyncpa [#allocation6], 1 }
 0x8cd   :  { %2763 = vsyncpa [#allocation6 + $0x1], 1 }
 0x8ce   :  { %2764 = vsyncpa [#allocation9], 1 }
 0x8cf   :  { %2765 = vsyncpa [#allocation12], 1 }
 0x8d0   :  { %2766 = vsyncpa [#allocation4], 1 }
 0x8d1   :  { %2768 = vsyncpa [#allocation4 + $0x1], 1 }

</bundles_post_ra>
